<compile_context>
chip_gen: v5e
topology: v5e:2x2
jax: 0.10.0
libtpu: 0.0.40
codegen_flags: <defaults>
</compile_context>

<pallas_src>
import functools
import math

import jax
import jax.numpy as jnp
from jax import lax
from jax.experimental import pallas as pl
from jax.experimental.pallas import tpu as pltpu


# ---------------------------------------------------------------------------
# Pallas kernel: streamed spatial reduction (grid-carried) + MLP epilogue
# ---------------------------------------------------------------------------
def _reduce_mlp_kernel(x_ref, w1_ref, b1_ref, w2_ref, b2_ref, w3_ref, b3_ref,
                       o_ref, acc_ref, *, reduce_op, inv_r):
    # x_ref  : (C, tr, tl)  block of the (C, R2p, L) view; L = rb * K
    # acc_ref: (C, 8, tl)   elementwise (sublane-space) running accumulator
    # o_ref  : (O, kw)      written only on the last r step
    is_max = reduce_op == "max"
    r = pl.program_id(1)

    def combine(a, b):
        return jnp.maximum(a, b) if is_max else a + b

    @pl.when(r == 0)
    def _init():
        if is_max:
            acc_ref[...] = jnp.full(acc_ref.shape, -jnp.inf, acc_ref.dtype)
        else:
            acc_ref[...] = jnp.zeros(acc_ref.shape, acc_ref.dtype)

    _, tr, _ = x_ref.shape
    cr = 8                                   # one sublane-row group per chunk
    nfull = tr // cr
    rem = tr - nfull * cr

    # Pure elementwise accumulate (1 VPU op per input vreg, 0 XLU): the 8
    # sublane slots are only collapsed once, in _finalize.
    def chunk_accum(i0, size):
        xs = x_ref[:, pl.ds(i0, size), :]                   # (C, size, tl)
        if size == cr:
            acc_ref[...] = combine(acc_ref[...], xs)
        else:
            acc_ref[:, 0:size, :] = combine(acc_ref[:, 0:size, :], xs)

    if nfull > 0:
        if nfull <= 8:
            for i in range(nfull):                          # fully visible to LLO
                chunk_accum(i * cr, cr)
        else:
            U = 4                                           # manual partial unroll
            n_outer = nfull // U
            def body(o, carry):
                base = pl.multiple_of(o * (U * cr), U * cr)
                for u in range(U):
                    chunk_accum(base + u * cr, cr)
                return carry
            lax.fori_loop(0, n_outer, body, 0)
            for i in range(n_outer * U, nfull):             # leftover full chunks
                chunk_accum(i * cr, cr)
    if rem > 0:
        chunk_accum(nfull * cr, rem)

    @pl.when(r == pl.num_programs(1) - 1)
    def _finalize():
        # Collapse the 8 sublane accumulator slots (identity-padded slots are no-ops).
        acc = acc_ref[...]                                   # (C, 8, tl)
        red = jnp.max(acc, axis=1) if is_max else jnp.sum(acc, axis=1)   # (C, tl)

        # Unpack the rb reduced row-groups folded onto the lane axis with a
        # log2(rb) halving tree (slices are 128-aligned while width >= 128).
        kw = o_ref.shape[1]
        width = red.shape[-1]
        while width > kw:
            half = width // 2
            red = combine(red[:, :half], red[:, half:])
            width = half
        if not is_max:
            red = red * inv_r                                # mean = sum / true R

        # MLP with transposed weights: channels on sublanes, kept-spatial on lanes.
        h1 = jnp.dot(w1_ref[...], red, preferred_element_type=jnp.float32) + b1_ref[...]
        h1 = jnp.maximum(h1, 0.0)
        h2 = jnp.dot(w2_ref[...], h1, preferred_element_type=jnp.float32) + b2_ref[...]
        h2 = jnp.maximum(h2, 0.0)
        out = jnp.dot(w3_ref[...], h2, preferred_element_type=jnp.float32) + b3_ref[...]
        o_ref[...] = out.astype(o_ref.dtype)


def _vmem_cap_bytes():
    """Usable scoped-VMEM target, derived from physical VMEM (v7x = 64 MiB)."""
    try:
        info = pltpu.get_tpu_info()
        cap = int(getattr(info, "vmem_capacity_bytes", 128 << 20))
    except Exception:
        cap = 128 << 20
    return max(32 << 20, int(cap * 0.7))


def _reduce_mlp_pallas(x_crk, params, reduce_op):
    """x_crk: (C, R, K) view — reduce over axis 1, MLP over channels. Returns (O, K)."""
    C, R, K = x_crk.shape
    Hd = params["w1"].shape[1]
    O = params["w3"].shape[1]
    is_max = reduce_op == "max"

    cap = _vmem_cap_bytes()
    max_lanes = 1024                          # lane-dense streaming regardless of C
    row_budget = int(min(8 << 20, max(1 << 20, (cap - (8 << 20)) // 3)))

    # --- rb: pack reduced rows onto the lane axis when K < 128 ----------------
    # rb is a power of two (clean log-tree unpack), divides R, rb*K <= max_lanes;
    # prefer rb*K a multiple of 128 so the hot loop uses full-lane vregs.
    rb = 1
    if K < 128:
        best_any, best_aligned = 1, None
        p = 1
        while p * 2 * K <= max_lanes and R % (p * 2) == 0:
            p *= 2
            best_any = p
            if (p * K) % 128 == 0:
                best_aligned = p
        rb = best_aligned if best_aligned is not None else best_any
    L = rb * K
    R2 = R // rb

    # --- lane tile (parallel grid axis) ---------------------------------------
    if rb > 1 or L <= max_lanes:
        tl = L
    else:
        tl = L                                 # full extent is always a legal block
        for t in range(max_lanes, 127, -128):
            if L % t == 0:
                tl = t
                break
        # TODO(synk): K > 1024 with no 128-multiple divisor streams the full lane
        # extent per block; padding K to a 128 multiple would tighten this corner.
    nl = L // tl
    kb = K // nl                               # output lanes per block

    # --- row tile: multiple of 8 (or full extent); pad rows if no exact tiling -
    max_rows = max(8, (row_budget // max(1, C * tl * 4)) // 8 * 8)
    pad_rows = 0
    if R2 <= max_rows:
        tr = R2
    else:
        tr = 0
        for t in range(max_rows, 7, -8):
            if R2 % t == 0:
                tr = t
                break
        if tr == 0:                            # no exact tiling under budget: cdiv + pad
            tr = max_rows
            pad_rows = pl.cdiv(R2, tr) * tr - R2
    R2p = R2 + pad_rows
    nr = R2p // tr

    x_view = x_crk.reshape(C, R2, L)           # free reshape (row-major)
    if pad_rows:
        pad_val = -jnp.inf if is_max else 0.0
        x_view = jnp.pad(x_view, ((0, 0), (0, pad_rows), (0, 0)),
                         constant_values=pad_val)

    w1t = params["w1"].T                       # (Hd, C)
    b1t = params["b1"].T                       # (Hd, 1)
    w2t = params["w2"].T                       # (Hd, Hd)
    b2t = params["b2"].T                       # (Hd, 1)
    w3t = params["w3"].T                       # (O, Hd)
    b3t = params["b3"].T                       # (O, 1)

    kernel = functools.partial(_reduce_mlp_kernel, reduce_op=reduce_op,
                               inv_r=1.0 / float(R))

    block_bytes = C * tr * tl * 4
    acc_bytes = C * 8 * tl * 4
    vmem_limit = int(min(cap, max(32 << 20, 2 * block_bytes + acc_bytes + (6 << 20))))

    flops = 2 * R * K * C + 2 * K * (C * Hd + Hd * Hd + Hd * O)
    bytes_accessed = 4 * (R * K * C + K * O + C * Hd + Hd * Hd + Hd * O + 2 * Hd + O)
    cost = pl.CostEstimate(flops=flops, transcendentals=0,
                           bytes_accessed=bytes_accessed)

    # TODO(synk): when rb > 1 the parallel axis has a single program, so v7x's
    # second TensorCore idles; a 2-way row split emitting partial reductions plus
    # a tiny combine/MLP step would recover it for large R.
    grid_spec = pltpu.PrefetchScalarGridSpec(
        num_scalar_prefetch=0,
        grid=(nl, nr),
        in_specs=[
            pl.BlockSpec((C, tr, tl), lambda j, r: (0, r, j)),
            pl.BlockSpec((Hd, C), lambda j, r: (0, 0)),
            pl.BlockSpec((Hd, 1), lambda j, r: (0, 0)),
            pl.BlockSpec((Hd, Hd), lambda j, r: (0, 0)),
            pl.BlockSpec((Hd, 1), lambda j, r: (0, 0)),
            pl.BlockSpec((O, Hd), lambda j, r: (0, 0)),
            pl.BlockSpec((O, 1), lambda j, r: (0, 0)),
        ],
        out_specs=pl.BlockSpec((O, kb), lambda j, r: (0, j)),
        scratch_shapes=[pltpu.VMEM((C, 8, tl), jnp.float32)],
    )
    return pl.pallas_call(
        kernel,
        out_shape=jax.ShapeDtypeStruct((O, K), jnp.float32),
        grid_spec=grid_spec,
        compiler_params=pltpu.CompilerParams(
            dimension_semantics=("parallel", "arbitrary"),
            vmem_limit_bytes=vmem_limit),
        cost_estimate=cost,
    )(x_view, w1t, b1t, w2t, b2t, w3t, b3t)


# ---------------------------------------------------------------------------
# Wrapper reproducing FeatureReduction3D.forward semantics
# ---------------------------------------------------------------------------
def feature_reduction_3d(x, params, reduce_dims=(2, 3), reduce_op="max"):
    """x: (1, C, H, W, D) float32, matching PyTorch NCHWD."""
    assert x.ndim == 5 and x.shape[0] == 1
    assert reduce_op in ("max", "mean")
    reduce_dims = tuple(sorted(reduce_dims))
    for d in reduce_dims:
        assert d >= 2

    C = x.shape[1]
    O = params["w3"].shape[1]
    spatial = (2, 3, 4)
    keep_dims = tuple(d for d in spatial if d not in reduce_dims)
    R = math.prod(x.shape[d] for d in reduce_dims)
    K = math.prod(x.shape[d] for d in keep_dims)

    if reduce_dims == spatial[:len(reduce_dims)]:
        # Fast path: reduced dims are a leading prefix of the spatial dims
        # (the module's default [2, 3]) -> pure reshape, zero data movement.
        x_crk = x.reshape(C, R, K)
    else:
        # TODO(synk): non-prefix reduce_dims (e.g. [3,4] or [2,4]) fall back to
        # one XLA transpose before the kernel; could be folded into the kernel
        # with a lane-axis reduction variant.
        perm = (0,) + tuple(d - 1 for d in reduce_dims) + tuple(d - 1 for d in keep_dims)
        x_crk = jnp.transpose(x[0], perm).reshape(C, R, K)

    out = _reduce_mlp_pallas(x_crk, params, reduce_op)        # (O, K)

    # PyTorch post-processing: reshape -> permute([3,0,1,2]) -> squeeze() -> unsqueeze(0)
    full_shape = (O,) + tuple(1 if d in reduce_dims else x.shape[d] for d in spatial)
    y = out.reshape(full_shape)
    # Mirrors torch .squeeze(): drops ALL size-1 dims (fragile if O==1 or a kept dim is 1).
    y = jnp.squeeze(y)
    return y[None]


# ---------------------------------------------------------------------------
# Deterministic parameter init (MLPNet(input, output, hidden, 1, bias=True))
# ---------------------------------------------------------------------------
def init_params(key, input_dim, output_dim, hidden_dim):
    ks = jax.random.split(key, 6)
    scale = 0.1
    return {
        "w1": scale * jax.random.normal(ks[0], (input_dim, hidden_dim), jnp.float32),
        "b1": scale * jax.random.normal(ks[1], (1, hidden_dim), jnp.float32),
        "w2": scale * jax.random.normal(ks[2], (hidden_dim, hidden_dim), jnp.float32),
        "b2": scale * jax.random.normal(ks[3], (1, hidden_dim), jnp.float32),
        "w3": scale * jax.random.normal(ks[4], (hidden_dim, output_dim), jnp.float32),
        "b3": scale * jax.random.normal(ks[5], (1, output_dim), jnp.float32),
    }


# Pure-JAX reference for sanity checking.
def _reference(x, params, reduce_dims=(2, 3), reduce_op="max"):
    if reduce_op == "max":
        r = jnp.max(x, axis=reduce_dims, keepdims=True)
    else:
        r = jnp.mean(x, axis=reduce_dims, keepdims=True)
    r = jnp.transpose(r[0], (1, 2, 3, 0))                     # (s2', s3', s4', C)
    flat = r.reshape(-1, x.shape[1])
    h = jnp.maximum(flat @ params["w1"] + params["b1"], 0.0)
    h = jnp.maximum(h @ params["w2"] + params["b2"], 0.0)
    o = h @ params["w3"] + params["b3"]
    o = o.reshape(r.shape[:-1] + (params["w3"].shape[1],))
    o = jnp.transpose(o, (3, 0, 1, 2))
    o = jnp.squeeze(o)
    return o[None]


if __name__ == "__main__":
    # Shapes consistent with the module defaults:
    # input_dim=8, output_dim=8, mlp_hidden_dim=8, reduce_dims=[2,3], op='max'
    B, C, H, W, D = 1, 8, 16, 16, 16
    input_dim, output_dim, hidden_dim = C, 8, 8
    reduce_dims = (2, 3)

    key = jax.random.PRNGKey(0)
    kx, kp, kx2 = jax.random.split(key, 3)
    x = jax.random.normal(kx, (B, C, H, W, D), jnp.float32)
    params = init_params(kp, input_dim, output_dim, hidden_dim)

    fn_max = jax.jit(functools.partial(feature_reduction_3d,
                                       reduce_dims=reduce_dims, reduce_op="max"))
    y = jax.block_until_ready(fn_max(x, params))
    y_ref = _reference(x, params, reduce_dims=reduce_dims, reduce_op="max")
    assert y.shape == (1, output_dim, D), y.shape
    assert jnp.allclose(y, y_ref, atol=1e-5, rtol=1e-5), float(jnp.max(jnp.abs(y - y_ref)))

    # Mean path.
    fn_mean = jax.jit(functools.partial(feature_reduction_3d,
                                        reduce_dims=reduce_dims, reduce_op="mean"))
    ym = jax.block_until_ready(fn_mean(x, params))
    ym_ref = _reference(x, params, reduce_dims=reduce_dims, reduce_op="mean")
    assert jnp.allclose(ym, ym_ref, atol=1e-4, rtol=1e-4)

    # Larger volume exercising the multi-step grid + unrolled inner row loop.
    xb = jax.random.normal(kx2, (1, C, 256, 256, 16), jnp.float32)
    yb = jax.block_until_ready(fn_max(xb, params))
    yb_ref = _reference(xb, params, reduce_dims=reduce_dims, reduce_op="max")
    assert yb.shape == (1, output_dim, 16), yb.shape
    assert jnp.allclose(yb, yb_ref, atol=1e-5, rtol=1e-5), float(jnp.max(jnp.abs(yb - yb_ref)))

    print("KERNEL_OK")
</pallas_src>

<mosaic_0001>
module attributes {stable_mosaic.version = 11 : i64} {
  func.func @_reduce_mlp_kernel(%arg0: i32, %arg1: i32, %arg2: memref<8x4x1024xf32, #tpu.memory_space<vmem>>, %arg3: memref<8x8xf32, #tpu.memory_space<vmem>>, %arg4: memref<8x1xf32, #tpu.memory_space<vmem>>, %arg5: memref<8x8xf32, #tpu.memory_space<vmem>>, %arg6: memref<8x1xf32, #tpu.memory_space<vmem>>, %arg7: memref<8x8xf32, #tpu.memory_space<vmem>>, %arg8: memref<8x1xf32, #tpu.memory_space<vmem>>, %arg9: memref<8x16xf32, #tpu.memory_space<vmem>>, %arg10: memref<8x8x1024xf32, #tpu.memory_space<vmem>>) attributes {dimension_semantics = [#tpu.dimension_semantics<parallel>, #tpu.dimension_semantics<arbitrary>], iteration_bounds = array<i64: 1, 1>, scalar_prefetch = 0 : i64, scratch_operands = 1 : i64, tpu.core_type = #tpu.core_type<tc>, window_params = [{transform_indices = @transform_0, window_bounds = array<i64: 8, 4, 1024>}, {pipeline_mode = #tpu.pipeline_mode<synchronous>, transform_indices = @transform_1, window_bounds = array<i64: 8, 8>}, {pipeline_mode = #tpu.pipeline_mode<synchronous>, transform_indices = @transform_2, window_bounds = array<i64: 8, 1>}, {pipeline_mode = #tpu.pipeline_mode<synchronous>, transform_indices = @transform_3, window_bounds = array<i64: 8, 8>}, {pipeline_mode = #tpu.pipeline_mode<synchronous>, transform_indices = @transform_4, window_bounds = array<i64: 8, 1>}, {pipeline_mode = #tpu.pipeline_mode<synchronous>, transform_indices = @transform_5, window_bounds = array<i64: 8, 8>}, {pipeline_mode = #tpu.pipeline_mode<synchronous>, transform_indices = @transform_6, window_bounds = array<i64: 8, 1>}, {transform_indices = @transform_7, window_bounds = array<i64: 8, 16>}]} {
    %c0_i32 = arith.constant 0 : i32
    %0 = arith.cmpi eq, %arg1, %c0_i32 : i32
    %1 = arith.extui %0 : i1 to i32
    %c0_i32_0 = arith.constant 0 : i32
    %2 = arith.cmpi ne, %1, %c0_i32_0 : i32
    scf.if %2 {
      %cst = arith.constant 0xFF800000 : f32
      %10 = vector.broadcast %cst : f32 to vector<8x8x1024xf32>
      %c0_11 = arith.constant 0 : index
      %c0_12 = arith.constant 0 : index
      %c0_13 = arith.constant 0 : index
      %11 = vector.load %arg10[%c0_11, %c0_12, %c0_13] : memref<8x8x1024xf32, #tpu.memory_space<vmem>>, vector<8x8x1024xf32>
      tpu.vector_store %arg10[%c0_11, %c0_12, %c0_13], %10 {strides = array<i32>} : memref<8x8x1024xf32, #tpu.memory_space<vmem>>, vector<8x8x1024xf32>,
    } else {
    }
    %c0 = arith.constant 0 : index
    %c0_1 = arith.constant 0 : index
    %c0_2 = arith.constant 0 : index
    %3 = vector.load %arg2[%c0, %c0_1, %c0_2] : memref<8x4x1024xf32, #tpu.memory_space<vmem>>, vector<8x4x1024xf32>
    %c0_3 = arith.constant 0 : index
    %c0_4 = arith.constant 0 : index
    %c0_5 = arith.constant 0 : index
    %4 = vector.load %arg10[%c0_3, %c0_4, %c0_5] : memref<8x8x1024xf32, #tpu.memory_space<vmem>>, vector<8x4x1024xf32>
    %5 = arith.maximumf %4, %3 : vector<8x4x1024xf32>
    %c0_6 = arith.constant 0 : index
    %c0_7 = arith.constant 0 : index
    %c0_8 = arith.constant 0 : index
    %6 = vector.load %arg10[%c0_6, %c0_7, %c0_8] : memref<8x8x1024xf32, #tpu.memory_space<vmem>>, vector<8x4x1024xf32>
    tpu.vector_store %arg10[%c0_6, %c0_7, %c0_8], %5 {strides = array<i32>} : memref<8x8x1024xf32, #tpu.memory_space<vmem>>, vector<8x4x1024xf32>,
    %c0_i32_9 = arith.constant 0 : i32
    %7 = arith.cmpi eq, %arg1, %c0_i32_9 : i32
    %8 = arith.extui %7 : i1 to i32
    %c0_i32_10 = arith.constant 0 : i32
    %9 = arith.cmpi ne, %8, %c0_i32_10 : i32
    scf.if %9 {
      %c0_11 = arith.constant 0 : index
      %c0_12 = arith.constant 0 : index
      %c0_13 = arith.constant 0 : index
      %10 = vector.load %arg10[%c0_11, %c0_12, %c0_13] : memref<8x8x1024xf32, #tpu.memory_space<vmem>>, vector<8x8x1024xf32>
      %cst = arith.constant dense<0xFF800000> : vector<8x1024xf32>
      %11 = vector.multi_reduction <maximumf>, %10, %cst [1] : vector<8x8x1024xf32> to vector<8x1024xf32>
      %12 = vector.extract_strided_slice %11 {offsets = [0, 0], sizes = [8, 512], strides = [1, 1]} : vector<8x1024xf32> to vector<8x512xf32>
      %13 = vector.extract_strided_slice %11 {offsets = [0, 512], sizes = [8, 512], strides = [1, 1]} : vector<8x1024xf32> to vector<8x512xf32>
      %14 = arith.maximumf %12, %13 : vector<8x512xf32>
      %15 = vector.extract_strided_slice %14 {offsets = [0, 0], sizes = [8, 256], strides = [1, 1]} : vector<8x512xf32> to vector<8x256xf32>
      %16 = vector.extract_strided_slice %14 {offsets = [0, 256], sizes = [8, 256], strides = [1, 1]} : vector<8x512xf32> to vector<8x256xf32>
      %17 = arith.maximumf %15, %16 : vector<8x256xf32>
      %18 = vector.extract_strided_slice %17 {offsets = [0, 0], sizes = [8, 128], strides = [1, 1]} : vector<8x256xf32> to vector<8x128xf32>
      %19 = vector.extract_strided_slice %17 {offsets = [0, 128], sizes = [8, 128], strides = [1, 1]} : vector<8x256xf32> to vector<8x128xf32>
      %20 = arith.maximumf %18, %19 : vector<8x128xf32>
      %21 = vector.extract_strided_slice %20 {offsets = [0, 0], sizes = [8, 64], strides = [1, 1]} : vector<8x128xf32> to vector<8x64xf32>
      %22 = vector.extract_strided_slice %20 {offsets = [0, 64], sizes = [8, 64], strides = [1, 1]} : vector<8x128xf32> to vector<8x64xf32>
      %23 = arith.maximumf %21, %22 : vector<8x64xf32>
      %24 = vector.extract_strided_slice %23 {offsets = [0, 0], sizes = [8, 32], strides = [1, 1]} : vector<8x64xf32> to vector<8x32xf32>
      %25 = vector.extract_strided_slice %23 {offsets = [0, 32], sizes = [8, 32], strides = [1, 1]} : vector<8x64xf32> to vector<8x32xf32>
      %26 = arith.maximumf %24, %25 : vector<8x32xf32>
      %27 = vector.extract_strided_slice %26 {offsets = [0, 0], sizes = [8, 16], strides = [1, 1]} : vector<8x32xf32> to vector<8x16xf32>
      %28 = vector.extract_strided_slice %26 {offsets = [0, 16], sizes = [8, 16], strides = [1, 1]} : vector<8x32xf32> to vector<8x16xf32>
      %29 = arith.maximumf %27, %28 : vector<8x16xf32>
      %c0_14 = arith.constant 0 : index
      %c0_15 = arith.constant 0 : index
      %30 = vector.load %arg3[%c0_14, %c0_15] : memref<8x8xf32, #tpu.memory_space<vmem>>, vector<8x8xf32>
      %cst_16 = arith.constant dense<0.000000e+00> : vector<8x16xf32>
      %31 = tpu.matmul %30, %29, %cst_16 {dimension_numbers = #tpu.dot_dimension_numbers<[1], [0], [0], [1], [0, 0, 1, 1], [], []>} : vector<8x8xf32>, vector<8x16xf32>, vector<8x16xf32> -> vector<8x16xf32>
      %c0_17 = arith.constant 0 : index
      %c0_18 = arith.constant 0 : index
      %32 = vector.load %arg4[%c0_17, %c0_18] : memref<8x1xf32, #tpu.memory_space<vmem>>, vector<8x1xf32>
      %33 = vector.broadcast %32 : vector<8x1xf32> to vector<8x16xf32>
      %34 = arith.addf %31, %33 : vector<8x16xf32>
      %cst_19 = arith.constant 0.000000e+00 : f32
      %35 = vector.broadcast %cst_19 : f32 to vector<8x16xf32>
      %36 = arith.maximumf %34, %35 : vector<8x16xf32>
      %c0_20 = arith.constant 0 : index
      %c0_21 = arith.constant 0 : index
      %37 = vector.load %arg5[%c0_20, %c0_21] : memref<8x8xf32, #tpu.memory_space<vmem>>, vector<8x8xf32>
      %cst_22 = arith.constant dense<0.000000e+00> : vector<8x16xf32>
      %38 = tpu.matmul %37, %36, %cst_22 {dimension_numbers = #tpu.dot_dimension_numbers<[1], [0], [0], [1], [0, 0, 1, 1], [], []>} : vector<8x8xf32>, vector<8x16xf32>, vector<8x16xf32> -> vector<8x16xf32>
      %c0_23 = arith.constant 0 : index
      %c0_24 = arith.constant 0 : index
      %39 = vector.load %arg6[%c0_23, %c0_24] : memref<8x1xf32, #tpu.memory_space<vmem>>, vector<8x1xf32>
      %40 = vector.broadcast %39 : vector<8x1xf32> to vector<8x16xf32>
      %41 = arith.addf %38, %40 : vector<8x16xf32>
      %cst_25 = arith.constant 0.000000e+00 : f32
      %42 = vector.broadcast %cst_25 : f32 to vector<8x16xf32>
      %43 = arith.maximumf %41, %42 : vector<8x16xf32>
      %c0_26 = arith.constant 0 : index
      %c0_27 = arith.constant 0 : index
      %44 = vector.load %arg7[%c0_26, %c0_27] : memref<8x8xf32, #tpu.memory_space<vmem>>, vector<8x8xf32>
      %cst_28 = arith.constant dense<0.000000e+00> : vector<8x16xf32>
      %45 = tpu.matmul %44, %43, %cst_28 {dimension_numbers = #tpu.dot_dimension_numbers<[1], [0], [0], [1], [0, 0, 1, 1], [], []>} : vector<8x8xf32>, vector<8x16xf32>, vector<8x16xf32> -> vector<8x16xf32>
      %c0_29 = arith.constant 0 : index
      %c0_30 = arith.constant 0 : index
      %46 = vector.load %arg8[%c0_29, %c0_30] : memref<8x1xf32, #tpu.memory_space<vmem>>, vector<8x1xf32>
      %47 = vector.broadcast %46 : vector<8x1xf32> to vector<8x16xf32>
      %48 = arith.addf %45, %47 : vector<8x16xf32>
      %c0_31 = arith.constant 0 : index
      %c0_32 = arith.constant 0 : index
      %49 = vector.load %arg9[%c0_31, %c0_32] : memref<8x16xf32, #tpu.memory_space<vmem>>, vector<8x16xf32>
      tpu.vector_store %arg9[%c0_31, %c0_32], %48 {strides = array<i32>} : memref<8x16xf32, #tpu.memory_space<vmem>>, vector<8x16xf32>,
    } else {
    }
    return
  }
  func.func @transform_0(%arg0: i32, %arg1: i32) -> (i32, i32, i32) {
    %c0_i32 = arith.constant 0 : i32
    %c0_i32_0 = arith.constant 0 : i32
    return %c0_i32, %arg1, %arg0 : i32, i32, i32
  }
  func.func @transform_1(%arg0: i32, %arg1: i32) -> (i32, i32) {
    %c0_i32 = arith.constant 0 : i32
    %c0_i32_0 = arith.constant 0 : i32
    %c0_i32_1 = arith.constant 0 : i32
    return %c0_i32, %c0_i32_0 : i32, i32
  }
  func.func @transform_2(%arg0: i32, %arg1: i32) -> (i32, i32) {
    %c0_i32 = arith.constant 0 : i32
    %c0_i32_0 = arith.constant 0 : i32
    %c0_i32_1 = arith.constant 0 : i32
    return %c0_i32, %c0_i32_0 : i32, i32
  }
  func.func @transform_3(%arg0: i32, %arg1: i32) -> (i32, i32) {
    %c0_i32 = arith.constant 0 : i32
    %c0_i32_0 = arith.constant 0 : i32
    %c0_i32_1 = arith.constant 0 : i32
    return %c0_i32, %c0_i32_0 : i32, i32
  }
  func.func @transform_4(%arg0: i32, %arg1: i32) -> (i32, i32) {
    %c0_i32 = arith.constant 0 : i32
    %c0_i32_0 = arith.constant 0 : i32
    %c0_i32_1 = arith.constant 0 : i32
    return %c0_i32, %c0_i32_0 : i32, i32
  }
  func.func @transform_5(%arg0: i32, %arg1: i32) -> (i32, i32) {
    %c0_i32 = arith.constant 0 : i32
    %c0_i32_0 = arith.constant 0 : i32
    %c0_i32_1 = arith.constant 0 : i32
    return %c0_i32, %c0_i32_0 : i32, i32
  }
  func.func @transform_6(%arg0: i32, %arg1: i32) -> (i32, i32) {
    %c0_i32 = arith.constant 0 : i32
    %c0_i32_0 = arith.constant 0 : i32
    %c0_i32_1 = arith.constant 0 : i32
    return %c0_i32, %c0_i32_0 : i32, i32
  }
  func.func @transform_7(%arg0: i32, %arg1: i32) -> (i32, i32) {
    %c0_i32 = arith.constant 0 : i32
    %c0_i32_0 = arith.constant 0 : i32
    return %c0_i32, %arg0 : i32, i32
  }
}

</mosaic_0001>

<bundles_post_ra>
// kernel: feature_reduction_3d.1
= control target key start
LH: loop header
LB: loop body
LE: loop exit
PB: predicated region body
PF: predicated region fallthrough
CT: control target
= control target key end

     0   :  { %v1380_v0 = vmov -inf   ;;  %s1813_s0 = inlined_call_operand.vmem [shape: f32[8,4,1024], index: 0, kind: input, shape index: {}]   ;;  %s1814_s1 = inlined_call_operand.vmem [shape: f32[8,8], index: 1, kind: input, shape index: {}]   ;;  %s1815_s2 = inlined_call_operand.vmem [shape: f32[8,1], index: 2, kind: input, shape index: {}]   ;;  %s1816_s3 = inlined_call_operand.vmem [shape: f32[8,8], index: 3, kind: input, shape index: {}]   ;;  %s1817_s4 = inlined_call_operand.vmem [shape: f32[8,1], index: 4, kind: input, shape index: {}]   ;;  %s1818_s5 = inlined_call_operand.vmem [shape: f32[8,8], index: 5, kind: input, shape index: {}]   ;;  %s1819_s6 = inlined_call_operand.vmem [shape: f32[8,1], index: 6, kind: input, shape index: {}]   ;;  %s1820_s7 = inlined_call_operand.hbm [shape: f32[8,16], index: 7, kind: output, shape index: {}]  }
   0x1   :  { %39 = vst [vmem:[#allocation2 + $0x180] sm:$0xff] %v1380_v0 }
   0x2   :  { %40 = vst [vmem:[#allocation2 + $0x110] sm:$0xff] %v1380_v0 }
   0x3   :  { %41 = vst [vmem:[#allocation2 + $0x118] sm:$0xff] %v1380_v0 }
   0x4   :  { %42 = vst [vmem:[#allocation2 + $0x98] sm:$0xff] %v1380_v0 }
   0x5   :  { %43 = vst [vmem:[#allocation2 + $0x120] sm:$0xff] %v1380_v0 }
   0x6   :  { %12 = vsyncpa [#allocation4], 0  ;;  %44 = vst [vmem:[#allocation2 + $0x150] sm:$0xff] %v1380_v0  ;;  %v95_v1 = vld [vmem:[%s1813_s0] sm:$0xff]  ;;  %v96_v2 = vld [vmem:[%s1813_s0 + $0x8] sm:$0xff]  ;;  %s1381_s10 = smov 64  }
   0x7   :  { %45 = vst [vmem:[#allocation2 + $0x108] sm:$0xff] %v1380_v0  ;;  %v97_v3 = vld [vmem:[%s1813_s0 + $0x10] sm:$0xff]  ;;  %v98_v4 = vld [vmem:[%s1813_s0 + $0x18] sm:$0xff]  ;;  %v99_v5 = vld [vmem:[%s1813_s0 + $0x20] sm:$0xff]  ;;  %vm1157_vm0 = vcmask 1041409   ;;  %vm1160_vm1 = vcmask 1042434  }
   0x8   :  { %46 = vst [vmem:[#allocation2 + $0x60] sm:$0xff] %v1380_v0  ;;  %v100_v6 = vld [vmem:[%s1813_s0 + $0x28] sm:$0xff]  ;;  %v101_v8 = vld [vmem:[%s1813_s0 + $0x30] sm:$0xff]  ;;  %v102_v15 = vld [vmem:[%s1813_s0 + $0x38] sm:$0xff]  ;;  %vm1163_vm2 = vcmask 1043459   ;;  %vm1166_vm3 = vcmask 1044484  }
   0x9   :  { %47 = vst [vmem:[#allocation2 + $0xe0] sm:$0xff] %v1380_v0  ;;  %v103_v17 = vld [vmem:[%s1813_s0 + $0x40] sm:$0xff]  ;;  %v135_v18 = vld [vmem:[#allocation2 + $0x180] sm:$0xf]  ;;  %v136_v20 = vld [vmem:[#allocation2 + $0x110] sm:$0xf] }
   0xa   :  { %48 = vst [vmem:[#allocation2 + $0x188] sm:$0xff] %v1380_v0  ;;  %v104_v19 = vld [vmem:[%s1813_s0 + $0x48] sm:$0xff]  ;;  %v105_v22 = vld [vmem:[%s1813_s0 + $0x50] sm:$0xff]  ;;  %v137_v23 = vld [vmem:[#allocation2 + $0x118] sm:$0xf]  ;;  %vm1169_vm4 = vcmask 1045509  }
   0xb   :  { %49 = vst [vmem:[#allocation2 + $0x138] sm:$0xff] %v1380_v0  ;;  %v106_v30 = vld [vmem:[%s1813_s0 + $0x58] sm:$0xff]  ;;  %v107_v35 = vld [vmem:[%s1813_s0 + $0x60] sm:$0xff]  ;;  %v108_v37 = vld [vmem:[%s1813_s0 + $0x68] sm:$0xff]  ;;  %vm1172_vm5 = vcmask 1046534   ;;  %vm1175_vm6 = vcmask 1047559  }
   0xc   :  { %50 = vst [vmem:[#allocation2 + $0x140] sm:$0xff] %v1380_v0  ;;  %v138_v36 = vld [vmem:[#allocation2 + $0x98] sm:$0xf]  ;;  %v139_v38 = vld [vmem:[#allocation2 + $0x120] sm:$0xf]  ;;  %v109_v40 = vld [vmem:[%s1813_s0 + $0x70] sm:$0xff] }
   0xd   :  { %51 = vst [vmem:[#allocation2 + $0x80] sm:$0xff] %v1380_v0  ;;  %v140_v41 = vld [vmem:[#allocation2 + $0x150] sm:$0xf]  ;;  %vm1178_vm7 = vcmask 64512   ;;  %s1273_s11 = sshll.u32 %s1820_s7, 4  ;;  %vm1264_vm8 = vcmask 130048   ;;  %s1274_s11 = int_to_ptr.hbm [resolvable:$true] %s1273_s11 }
   0xe   :  { %52 = vst [vmem:[#allocation2 + $0x1a8] sm:$0xff] %v1380_v0  ;;  %v110_v44 = vld [vmem:[%s1813_s0 + $0x78] sm:$0xff]  ;;  %v141_v45 = vld [vmem:[#allocation2 + $0x108] sm:$0xf] }
   0xf   :  { %53 = vst [vmem:[#allocation2 + $0x1b8] sm:$0xff] %v1380_v0  ;;  %v142_v53 = vld [vmem:[#allocation2 + $0x60] sm:$0xf] }
  0x10   :  { %54 = vst [vmem:[#allocation2 + $0x28] sm:$0xff] %v1380_v0  ;;  %v143_v57 = vld [vmem:[#allocation2 + $0xe0] sm:$0xf] }
  0x11   :  { %223 = vst [vmem:[#allocation1] ss:$2 sm:$0xff] %v95_v1  ;;  %v144_v61 = vld [vmem:[#allocation2 + $0x188] sm:$0xf] }
  0x12   :  { %225 = vst [vmem:[#allocation1 + $0x10] ss:$2 sm:$0xff] %v96_v2  ;;  %v145_v1 = vld [vmem:[#allocation2 + $0x138] sm:$0xf] }
  0x13   :  { %227 = vst [vmem:[#allocation1 + $0x20] ss:$2 sm:$0xff] %v97_v3 }
  0x14   :  { %229 = vst [vmem:[#allocation1 + $0x30] ss:$2 sm:$0xff] %v98_v4  ;;  %v146_v4 = vld [vmem:[#allocation2 + $0x140] sm:$0xf] }
  0x15   :  { %31 = vst [vmem:[#allocation2 + $0xb0] sm:$0xff] %v1380_v0 }
  0x16   :  { %32 = vst [vmem:[#allocation2 + $0x1b0] sm:$0xff] %v1380_v0 }
  0x17   :  { %33 = vst [vmem:[#allocation2 + $0xd8] sm:$0xff] %v1380_v0 }
  0x18   :  { %v1463_v7 = vld.sshfl [vmem:[#allocation1] sm:$0xff pattern:$0x75316420]  ;;  %v1468_v9 = vld.sshfl [vmem:[#allocation1 + $0x8] sm:$0xff pattern:$0x75316420] }
  0x19   :  { %v1470_v10 = vld.sshfl [vmem:[#allocation1 + $0x10] sm:$0xff pattern:$0x75316420]  ;;  %v1472_v11 = vld.sshfl [vmem:[#allocation1 + $0x18] sm:$0xff pattern:$0x75316420] }
  0x1a   :  { %v1474_v12 = vld.sshfl [vmem:[#allocation1 + $0x20] sm:$0xff pattern:$0x75316420]  ;;  %v1476_v13 = vld.sshfl [vmem:[#allocation1 + $0x28] sm:$0xff pattern:$0x75316420] }
  0x1b   :  { %v1478_v14 = vld.sshfl [vmem:[#allocation1 + $0x30] sm:$0xff pattern:$0x75316420]  ;;  %v1483_v16 = vld.sshfl [vmem:[#allocation1 + $0x38] sm:$0xff pattern:$0x75316420] }
  0x1c   :  { %238 = vst [vmem:[#allocation1] ss:$2 sm:$0xff] %v99_v5 }
  0x1d   :  { %239 = vst [vmem:[#allocation1 + $0x10] ss:$2 sm:$0xff] %v100_v6 }
  0x1e   :  { %240 = vst [vmem:[#allocation1 + $0x20] ss:$2 sm:$0xff] %v101_v8  ;;  %v147_v8 = vld [vmem:[#allocation2 + $0x80] sm:$0xf] }
  0x1f   :  { %241 = vst [vmem:[#allocation1 + $0x30] ss:$2 sm:$0xff] %v102_v15 }
  0x20   :  { %34 = vst [vmem:[#allocation2 + $0x18] sm:$0xff] %v1380_v0 }
  0x21   :  { %35 = vst [vmem:[#allocation2 + $0x50] sm:$0xff] %v1380_v0 }
  0x22   :  { %36 = vst [vmem:[#allocation2 + $0x168] sm:$0xff] %v1380_v0 }
  0x23   :  { %v242_v21 = vld.sshfl [vmem:[#allocation1] sm:$0xff pattern:$0x75316420]  ;;  %v243_v24 = vld.sshfl [vmem:[#allocation1 + $0x8] sm:$0xff pattern:$0x75316420] }
  0x24   :  { %v244_v25 = vld.sshfl [vmem:[#allocation1 + $0x10] sm:$0xff pattern:$0x75316420]  ;;  %v245_v26 = vld.sshfl [vmem:[#allocation1 + $0x18] sm:$0xff pattern:$0x75316420]  ;;  %v394_v32 = vmax.f32 %v135_v18, %v242_v21  ;;  %v395_v33 = vmax.f32 %v136_v20, %v243_v24 }
  0x25   :  { %v246_v27 = vld.sshfl [vmem:[#allocation1 + $0x20] sm:$0xff pattern:$0x75316420]  ;;  %v247_v28 = vld.sshfl [vmem:[#allocation1 + $0x28] sm:$0xff pattern:$0x75316420]  ;;  %v396_v34 = vmax.f32 %v137_v23, %v244_v25  ;;  %v397_v51 = vmax.f32 %v138_v36, %v245_v26 }
  0x26   :  { %v248_v29 = vld.sshfl [vmem:[#allocation1 + $0x30] sm:$0xff pattern:$0x75316420]  ;;  %v249_v31 = vld.sshfl [vmem:[#allocation1 + $0x38] sm:$0xff pattern:$0x75316420]  ;;  %v398_v54 = vmax.f32 %v139_v38, %v246_v27  ;;  %v399_v58 = vmax.f32 %v140_v41, %v247_v28 }
  0x27   :  { %250 = vst [vmem:[#allocation1] ss:$2 sm:$0xff] %v103_v17  ;;  %v400_v62 = vmax.f32 %v141_v45, %v248_v29  ;;  %v401_v2 = vmax.f32 %v142_v53, %v249_v31  ;;  %v148_v17 = vld [vmem:[#allocation2 + $0x1a8] sm:$0xf]  ;;  %v149_v20 = vld [vmem:[#allocation2 + $0x1b8] sm:$0xf] }
  0x28   :  { %251 = vst [vmem:[#allocation1 + $0x10] ss:$2 sm:$0xff] %v104_v19  ;;  %v150_v23 = vld [vmem:[#allocation2 + $0x28] sm:$0xf] }
  0x29   :  { %252 = vst [vmem:[#allocation1 + $0x20] ss:$2 sm:$0xff] %v105_v22 }
  0x2a   :  { %253 = vst [vmem:[#allocation1 + $0x30] ss:$2 sm:$0xff] %v106_v30 }
  0x2b   :  { %458 = vst [vmem:[#allocation2 + $0x180] sm:$0xf] %v394_v32 }
  0x2c   :  { %459 = vst [vmem:[#allocation2 + $0x110] sm:$0xf] %v395_v33 }
  0x2d   :  { %460 = vst [vmem:[#allocation2 + $0x118] sm:$0xf] %v396_v34 }
  0x2e   :  { %v254_v39 = vld.sshfl [vmem:[#allocation1] sm:$0xff pattern:$0x75316420]  ;;  %v255_v42 = vld.sshfl [vmem:[#allocation1 + $0x8] sm:$0xff pattern:$0x75316420] }
  0x2f   :  { %v256_v43 = vld.sshfl [vmem:[#allocation1 + $0x10] sm:$0xff pattern:$0x75316420]  ;;  %v257_v46 = vld.sshfl [vmem:[#allocation1 + $0x18] sm:$0xff pattern:$0x75316420]  ;;  %v402_v5 = vmax.f32 %v143_v57, %v254_v39  ;;  %v403_v15 = vmax.f32 %v144_v61, %v255_v42 }
  0x30   :  { %v258_v47 = vld.sshfl [vmem:[#allocation1 + $0x20] sm:$0xff pattern:$0x75316420]  ;;  %v259_v48 = vld.sshfl [vmem:[#allocation1 + $0x28] sm:$0xff pattern:$0x75316420]  ;;  %v404_v18 = vmax.f32 %v145_v1, %v256_v43  ;;  %v405_v21 = vmax.f32 %v146_v4, %v257_v46 }
  0x31   :  { %v260_v49 = vld.sshfl [vmem:[#allocation1 + $0x30] sm:$0xff pattern:$0x75316420]  ;;  %v1512_v50 = vld.sshfl [vmem:[#allocation1 + $0x38] sm:$0xff pattern:$0x75316420]  ;;  %v406_v24 = vmax.f32 %v147_v8, %v258_v47  ;;  %v407_v26 = vmax.f32 %v148_v17, %v259_v48 }
  0x32   :  { %262 = vst [vmem:[#allocation1] ss:$2 sm:$0xff] %v107_v35  ;;  %v525_v52 = vld [vmem:[#allocation2 + $0x180] sm:$0xff]  ;;  %v408_v27 = vmax.f32 %v149_v20, %v260_v49  ;;  %v409_v30 = vmax.f32 %v150_v23, %v1512_v50 }
  0x33   :  { %263 = vst [vmem:[#allocation1 + $0x10] ss:$2 sm:$0xff] %v108_v37  ;;  %v526_v55 = vld [vmem:[#allocation2 + $0x110] sm:$0xff]  ;;  %v629_v56 = vrot.slane %v525_v52, 4 }
  0x34   :  { %264 = vst [vmem:[#allocation1 + $0x20] ss:$2 sm:$0xff] %v109_v40  ;;  %v527_v59 = vld [vmem:[#allocation2 + $0x118] sm:$0xff]  ;;  %v635_v60 = vrot.slane %v526_v55, 4 }
  0x35   :  { %265 = vst [vmem:[#allocation1 + $0x30] ss:$2 sm:$0xff] %v110_v44  ;;  %v630_v63 = vmax.f32 %v525_v52, %v629_v56  ;;  %v641_v3 = vrot.slane %v527_v59, 4 }
  0x36   :  { %461 = vst [vmem:[#allocation2 + $0x98] sm:$0xf] %v397_v51  ;;  %v636_v6 = vmax.f32 %v526_v55, %v635_v60 }
  0x37   :  { %462 = vst [vmem:[#allocation2 + $0x120] sm:$0xf] %v398_v54  ;;  %v631_v19 = vrot.slane %v630_v63, 2  ;;  %v642_v22 = vmax.f32 %v527_v59, %v641_v3 }
  0x38   :  { %463 = vst [vmem:[#allocation2 + $0x150] sm:$0xf] %v399_v58  ;;  %v637_v25 = vrot.slane %v636_v6, 2 }
  0x39   :  { %464 = vst [vmem:[#allocation2 + $0x108] sm:$0xf] %v400_v62  ;;  %v632_v29 = vmax.f32 %v630_v63, %v631_v19  ;;  %v643_v32 = vrot.slane %v642_v22, 2 }
  0x3a   :  { %465 = vst [vmem:[#allocation2 + $0x60] sm:$0xf] %v401_v2  ;;  %v638_v35 = vmax.f32 %v636_v6, %v637_v25 }
  0x3b   :  { %466 = vst [vmem:[#allocation2 + $0xe0] sm:$0xf] %v402_v5  ;;  %v633_v41 = vrot.slane %v632_v29, 1  ;;  %v644_v45 = vmax.f32 %v642_v22, %v643_v32 }
  0x3c   :  { %467 = vst [vmem:[#allocation2 + $0x188] sm:$0xf] %v403_v15  ;;  %v639_v50 = vrot.slane %v638_v35, 1 }
  0x3d   :  { %468 = vst [vmem:[#allocation2 + $0x138] sm:$0xf] %v404_v18  ;;  %v528_v28 = vld [vmem:[#allocation2 + $0x98] sm:$0xff]  ;;  %v645_v63 = vrot.slane %v644_v45, 1  ;;  %v1521_v22 = vmax.f32 %v632_v29, %v633_v41 }
  0x3e   :  { %469 = vst [vmem:[#allocation2 + $0x140] sm:$0xf] %v405_v21  ;;  %v529_v31 = vld [vmem:[#allocation2 + $0x120] sm:$0xff]  ;;  %v647_v33 = vrot.slane %v528_v28, 4 }
  0x3f   :  { %470 = vst [vmem:[#allocation2 + $0x80] sm:$0xf] %v406_v24  ;;  %v530_v34 = vld [vmem:[#allocation2 + $0x150] sm:$0xff]  ;;  %v653_v36 = vrot.slane %v529_v31, 4 }
  0x40   :  { %471 = vst [vmem:[#allocation2 + $0x1a8] sm:$0xf] %v407_v26  ;;  %v531_v37 = vld [vmem:[#allocation2 + $0x108] sm:$0xff]  ;;  %v648_v38 = vmax.f32 %v528_v28, %v647_v33  ;;  %v659_v39 = vrot.slane %v530_v34, 4  ;;  %v1524_v26 = vmax.f32 %v638_v35, %v639_v50 }
  0x41   :  { %472 = vst [vmem:[#allocation2 + $0x1b8] sm:$0xf] %v408_v27  ;;  %v532_v40 = vld [vmem:[#allocation2 + $0x60] sm:$0xff]  ;;  %v654_v42 = vmax.f32 %v529_v31, %v653_v36  ;;  %v665_v43 = vrot.slane %v531_v37, 4  ;;  %v1526_v27 = vmax.f32 %v644_v45, %v645_v63 }
  0x42   :  { %473 = vst [vmem:[#allocation2 + $0x28] sm:$0xf] %v409_v30  ;;  %v533_v44 = vld [vmem:[#allocation2 + $0xe0] sm:$0xff]  ;;  %v649_v46 = vrot.slane %v648_v38, 2  ;;  %v660_v47 = vmax.f32 %v530_v34, %v659_v39  ;;  %v671_v48 = vrot.slane %v532_v40, 4 }
  0x43   :  { %v534_v49 = vld [vmem:[#allocation2 + $0x188] sm:$0xff]  ;;  %v655_v51 = vrot.slane %v654_v42, 2  ;;  %v666_v52 = vmax.f32 %v531_v37, %v665_v43  ;;  %v677_v53 = vrot.slane %v533_v44, 4  ;;  %37 = vst [vmem:[#allocation2 + $0x130] sm:$0xff] %v1380_v0 }
  0x44   :  { %v535_v54 = vld [vmem:[#allocation2 + $0x138] sm:$0xff]  ;;  %v650_v55 = vmax.f32 %v648_v38, %v649_v46  ;;  %v661_v56 = vrot.slane %v660_v47, 2  ;;  %v672_v57 = vmax.f32 %v532_v40, %v671_v48  ;;  %v683_v58 = vrot.slane %v534_v49, 4  ;;  %38 = vst [vmem:[#allocation2 + $0x48] sm:$0xff] %v1380_v0 }
  0x45   :  { %v656_v59 = vmax.f32 %v654_v42, %v655_v51  ;;  %v667_v60 = vrot.slane %v666_v52, 2  ;;  %v678_v61 = vmax.f32 %v533_v44, %v677_v53  ;;  %v689_v62 = vrot.slane %v535_v54, 4  ;;  %55 = vst [vmem:[#allocation2 + $0x1e8] sm:$0xff] %v1380_v0  ;;  %v536_v4 = vld [vmem:[#allocation2 + $0x140] sm:$0xff] }
  0x46   :  { %v651_v1 = vrot.slane %v650_v55, 1  ;;  %v673_v2 = vrot.slane %v672_v57, 2  ;;  %v684_v3 = vmax.f32 %v534_v49, %v683_v58  ;;  %56 = vst [vmem:[#allocation2 + $0xf8] sm:$0xff] %v1380_v0  ;;  %v662_v5 = vmax.f32 %v660_v47, %v661_v56  ;;  %v537_v17 = vld [vmem:[#allocation2 + $0x80] sm:$0xff] }
  0x47   :  { %v668_v6 = vmax.f32 %v666_v52, %v667_v60  ;;  %v679_v8 = vrot.slane %v678_v61, 2  ;;  %v690_v15 = vmax.f32 %v535_v54, %v689_v62  ;;  %57 = vst [vmem:[#allocation2 + $0x160] sm:$0xff] %v1380_v0  ;;  %v657_v18 = vrot.slane %v656_v59, 1  ;;  %v538_v21 = vld [vmem:[#allocation2 + $0x1a8] sm:$0xff] }
  0x48   :  { %v674_v19 = vmax.f32 %v672_v57, %v673_v2  ;;  %v685_v20 = vrot.slane %v684_v3, 2  ;;  %58 = vst [vmem:[#allocation2 + $0x30] sm:$0xff] %v1380_v0  ;;  %v539_v25 = vld [vmem:[#allocation2 + $0x1b8] sm:$0xff]  ;;  %v695_v30 = vrot.slane %v536_v4, 4  ;;  %v1529_v32 = vmax.f32 %v650_v55, %v651_v1 }
  0x49   :  { %v680_v23 = vmax.f32 %v678_v61, %v679_v8  ;;  %v691_v24 = vrot.slane %v690_v15, 2  ;;  %59 = vst [vmem:[#allocation2 + $0x1e0] sm:$0xff] %v1380_v0  ;;  %v540_v31 = vld [vmem:[#allocation2 + $0x28] sm:$0xff]  ;;  %v663_v33 = vrot.slane %v662_v5, 1  ;;  %v669_v34 = vrot.slane %v668_v6, 1 }
  0x4a   :  { %v686_v28 = vmax.f32 %v684_v3, %v685_v20  ;;  %60 = vst [vmem:[#allocation2] sm:$0xff] %v1380_v0  ;;  %v701_v29 = vrot.slane %v537_v17, 4  ;;  %v658_v36 = vmax.f32 %v656_v59, %v657_v18  ;;  %v675_v37 = vrot.slane %v674_v19, 1 }
  0x4b   :  { %61 = vst [vmem:[#allocation2 + $0xf0] sm:$0xff] %v1380_v0  ;;  %v696_v38 = vmax.f32 %v536_v4, %v695_v30  ;;  %v707_v39 = vrot.slane %v538_v21, 4  ;;  %v681_v35 = vrot.slane %v680_v23, 1  ;;  %v692_v40 = vmax.f32 %v690_v15, %v691_v24 }
  0x4c   :  { %62 = vst [vmem:[#allocation2 + $0x8] sm:$0xff] %v1380_v0  ;;  %v702_v41 = vmax.f32 %v537_v17, %v701_v29  ;;  %v713_v42 = vrot.slane %v539_v25, 4  ;;  %v687_v43 = vrot.slane %v686_v28, 1  ;;  %v719_v46 = vrot.slane %v540_v31, 4 }
  0x4d   :  { %63 = vst [vmem:[#allocation2 + $0x148] sm:$0xff] %v1380_v0  ;;  %v697_v44 = vrot.slane %v696_v38, 2  ;;  %v708_v45 = vmax.f32 %v538_v21, %v707_v39  ;;  %v664_v47 = vmax.f32 %v662_v5, %v663_v33  ;;  %v670_v48 = vmax.f32 %v668_v6, %v669_v34  ;;  %v112_v39 = vld [vmem:[%s1813_s0 + $0x88] sm:$0xff] }
  0x4e   :  { %64 = vst [vmem:[#allocation2 + $0x1d0] sm:$0xff] %v1380_v0  ;;  %v703_v49 = vrot.slane %v702_v41, 2  ;;  %v714_v50 = vmax.f32 %v539_v25, %v713_v42  ;;  %v676_v51 = vmax.f32 %v674_v19, %v675_v37  ;;  %v720_v54 = vmax.f32 %v540_v31, %v719_v46  ;;  %v266_v37 = vld.sshfl [vmem:[#allocation1] sm:$0xff pattern:$0x75316420]  ;;  %v113_v42 = vld [vmem:[%s1813_s0 + $0x90] sm:$0xff] }
  0x4f   :  { %65 = vst [vmem:[#allocation2 + $0x100] sm:$0xff] %v1380_v0  ;;  %v698_v52 = vmax.f32 %v696_v38, %v697_v44  ;;  %v709_v53 = vrot.slane %v708_v45, 2  ;;  %v682_v55 = vmax.f32 %v680_v23, %v681_v35  ;;  %v693_v56 = vrot.slane %v692_v40, 1  ;;  %v267_v38 = vld.sshfl [vmem:[#allocation1 + $0x8] sm:$0xff pattern:$0x75316420] }
  0x50   :  { %66 = vst [vmem:[#allocation2 + $0xc8] sm:$0xff] %v1380_v0  ;;  %v704_v57 = vmax.f32 %v702_v41, %v703_v49  ;;  %v715_v58 = vrot.slane %v714_v50, 2  ;;  %v688_v59 = vmax.f32 %v686_v28, %v687_v43  ;;  %v721_v62 = vrot.slane %v720_v54, 2  ;;  %v127_v35 = vld [vmem:[#allocation2 + $0xb0] sm:$0xf] }
  0x51   :  { %67 = vst [vmem:[#allocation2 + $0x40] sm:$0xff] %v1380_v0  ;;  %v699_v60 = vrot.slane %v698_v52, 1  ;;  %v710_v61 = vmax.f32 %v708_v45, %v709_v53  ;;  %v969_v2 = vmax.f32 %v1521_v22, %v658_v36  ;;  %v970_v3 = vmax.f32 %v1524_v26, %v664_v47  ;;  %v111_v36 = vld [vmem:[%s1813_s0 + $0x80] sm:$0xff]  ;;  %v1579_v41 = vld.sshfl [vmem:[#allocation1 + $0x18] sm:$0xff pattern:$0x75316420] }
  0x52   :  { %68 = vst [vmem:[#allocation2 + $0x1f8] sm:$0xff] %v1380_v0  ;;  %v705_v63 = vrot.slane %v704_v57, 1  ;;  %v716_v1 = vmax.f32 %v714_v50, %v715_v58  ;;  %v722_v5 = vmax.f32 %v720_v54, %v721_v62  ;;  %v971_v6 = vmax.f32 %v1526_v27, %v670_v48  ;;  %v128_v43 = vld [vmem:[#allocation2 + $0x1b0] sm:$0xf]  ;;  %v129_v45 = vld [vmem:[#allocation2 + $0xd8] sm:$0xf] }
  0x53   :  { %69 = vst [vmem:[#allocation2 + $0x20] sm:$0xff] %v1380_v0  ;;  %v711_v4 = vrot.slane %v710_v61, 1  ;;  %v972_v8 = vmax.f32 %v1529_v32, %v676_v51  ;;  %v694_v15 = vmax.f32 %v692_v40, %v693_v56  ;;  %v700_v19 = vmax.f32 %v698_v52, %v699_v60  ;;  %v268_v40 = vld.sshfl [vmem:[#allocation1 + $0x10] sm:$0xff pattern:$0x75316420]  ;;  %v114_v49 = vld [vmem:[%s1813_s0 + $0x98] sm:$0xff] }
  0x54   :  { %70 = vst [vmem:[#allocation2 + $0x128] sm:$0xff] %v1380_v0  ;;  %v706_v17 = vmax.f32 %v704_v57, %v705_v63  ;;  %v717_v18 = vrot.slane %v716_v1, 1  ;;  %v723_v21 = vrot.slane %v722_v5, 1  ;;  %v999_v26 = vmax.f32 %v969_v2, %v971_v6  ;;  %v1585_v44 = vld.sshfl [vmem:[#allocation1 + $0x20] sm:$0xff pattern:$0x75316420] }
  0x55   :  { %71 = vst [vmem:[#allocation2 + $0x1a0] sm:$0xff] %v1380_v0  ;;  %v712_v20 = vmax.f32 %v710_v61, %v711_v4  ;;  %v1000_v27 = vmax.f32 %v970_v3, %v972_v8  ;;  %v1588_v46 = vld.sshfl [vmem:[#allocation1 + $0x28] sm:$0xff pattern:$0x75316420]  ;;  %v130_v47 = vld [vmem:[#allocation2 + $0x18] sm:$0xf]  ;;  %v386_v51 = vmax.f32 %v127_v35, %v1463_v7  ;;  %v387_v53 = vmax.f32 %v128_v43, %v1468_v9 }
  0x56   :  { %72 = vst [vmem:[#allocation2 + $0x1f0] sm:$0xff] %v1380_v0  ;;  %v718_v22 = vmax.f32 %v716_v1, %v717_v18  ;;  %v973_v23 = vmax.f32 %v682_v55, %v706_v17  ;;  %v724_v24 = vmax.f32 %v722_v5, %v723_v21  ;;  %v1591_v48 = vld.sshfl [vmem:[#allocation1 + $0x30] sm:$0xff pattern:$0x75316420]  ;;  %v131_v52 = vld [vmem:[#allocation2 + $0x50] sm:$0xf]  ;;  %v389_v56 = vmax.f32 %v130_v47, %v1472_v11 }
  0x57   :  { %73 = vst [vmem:[#allocation2 + $0xe8] sm:$0xff] %v1380_v0  ;;  %v974_v25 = vmax.f32 %v688_v59, %v712_v20  ;;  %v1552_v33 = vmax.f32 %v999_v26, %v1000_v27  ;;  %v1596_v50 = vld.sshfl [vmem:[#allocation1 + $0x38] sm:$0xff pattern:$0x75316420]  ;;  %v132_v54 = vld [vmem:[#allocation2 + $0x168] sm:$0xf]  ;;  %v390_v58 = vmax.f32 %v131_v52, %v1474_v12 }
  0x58   :  { %74 = vst [vmem:[#allocation2 + $0x78] sm:$0xff] %v1380_v0  ;;  %v975_v28 = vmax.f32 %v694_v15, %v718_v22  ;;  %v976_v30 = vmax.f32 %v700_v19, %v724_v24  ;;  %v133_v55 = vld [vmem:[#allocation2 + $0x130] sm:$0xf]  ;;  %v134_v57 = vld [vmem:[#allocation2 + $0x48] sm:$0xf]  ;;  %v391_v60 = vmax.f32 %v132_v54, %v1476_v13 }
  0x59   :  { %75 = vst [vmem:[#allocation2 + $0x70] sm:$0xff] %v1380_v0  ;;  %v151_v59 = vld [vmem:[#allocation2 + $0x1e8] sm:$0xf]  ;;  %v152_v7 = vld [vmem:[#allocation2 + $0xf8] sm:$0xf]  ;;  %v392_v61 = vmax.f32 %v133_v55, %v1478_v14  ;;  %v393_v62 = vmax.f32 %v134_v57, %v1483_v16 }
  0x5a   :  { %76 = vst [vmem:[#allocation2 + $0x90] sm:$0xff] %v1380_v0  ;;  %v1001_v31 = vmax.f32 %v973_v23, %v975_v28  ;;  %v1002_v32 = vmax.f32 %v974_v25, %v976_v30  ;;  %v153_v9 = vld [vmem:[#allocation2 + $0x160] sm:$0xf]  ;;  %v410_v63 = vmax.f32 %v151_v59, %v266_v37  ;;  %v411_v1 = vmax.f32 %v152_v7, %v267_v38  ;;  %v157_v3 = vld [vmem:[#allocation2 + $0xf0] sm:$0xf] }
  0x5b   :  { %77 = vst [vmem:[#allocation2 + $0x1d8] sm:$0xff] %v1380_v0  ;;  %v155_v11 = vld [vmem:[#allocation2 + $0x1e0] sm:$0xf]  ;;  %v412_v2 = vmax.f32 %v153_v9, %v268_v40  ;;  %v158_v14 = vld [vmem:[#allocation2 + $0x8] sm:$0xf]  ;;  %v416_v18 = vmax.f32 %v157_v3, %v1591_v48  ;;  %v115_v9 = vld [vmem:[%s1813_s0 + $0xa0] sm:$0xff] }
  0x5c   :  { %78 = vst [vmem:[#allocation2 + $0xd0] sm:$0xff] %v1380_v0  ;;  %v1556_v34 = vmax.f32 %v1001_v31, %v1002_v32  ;;  %v156_v12 = vld [vmem:[#allocation2] sm:$0xf]  ;;  %v414_v5 = vmax.f32 %v155_v11, %v1585_v44  ;;  %v417_v22 = vmax.f32 %v158_v14, %v1596_v50 }
  0x5d   :  { %79 = vst [vmem:[#allocation2 + $0xb8] sm:$0xff] %v1380_v0  ;;  %v415_v8 = vmax.f32 %v156_v12, %v1588_v46  ;;  %v116_v3 = vld [vmem:[%s1813_s0 + $0xa8] sm:$0xff] }
  0x5e   :  { %80 = vst [vmem:[#allocation2 + $0x88] sm:$0xff] %v1380_v0  ;;  %v1291_v29 = vpack.i.bf16 %v1556_v34, %v1552_v33 }
  0x5f   :  { %81 = vst [vmem:[#allocation2 + $0xa8] sm:$0xff] %v1380_v0 }
  0x60   :  { %82 = vst [vmem:[#allocation2 + $0x1c8] sm:$0xff] %v1380_v0  ;;  %1292 = vrot.lane.b32.xlu0 %v1291_v29, %s1381_s10 }
  0x61   :  { %83 = vst [vmem:[#allocation2 + $0x170] sm:$0xff] %v1380_v0 }
  0x62   :  { %84 = vst [vmem:[#allocation2 + $0x178] sm:$0xff] %v1380_v0 }
  0x63   :  { %85 = vst [vmem:[#allocation2 + $0x68] sm:$0xff] %v1380_v0 }
  0x64   :  { %86 = vst [vmem:[#allocation2 + $0x190] sm:$0xff] %v1380_v0 }
  0x65   :  { %87 = vst [vmem:[#allocation2 + $0x198] sm:$0xff] %v1380_v0 }
  0x66   :  { %88 = vst [vmem:[#allocation2 + $0x38] sm:$0xff] %v1380_v0 }
  0x67   :  { %89 = vst [vmem:[#allocation2 + $0xc0] sm:$0xff] %v1380_v0 }
  0x68   :  { %90 = vst [vmem:[#allocation2 + $0x1c0] sm:$0xff] %v1380_v0 }
  0x69   :  { %91 = vst [vmem:[#allocation2 + $0x158] sm:$0xff] %v1380_v0 }
  0x6a   :  { %92 = vst [vmem:[#allocation2 + $0x10] sm:$0xff] %v1380_v0 }
  0x6b   :  { %93 = vst [vmem:[#allocation2 + $0x58] sm:$0xff] %v1380_v0 }
  0x6c   :  { %94 = vst [vmem:[#allocation2 + $0xa0] sm:$0xff] %v1380_v0  ;;  %v388_v0 = vmax.f32 %v129_v45, %v1470_v10  ;;  %v154_v10 = vld [vmem:[#allocation2 + $0x30] sm:$0xf] }
  0x6d   :  { %274 = vst [vmem:[#allocation1] ss:$2 sm:$0xff] %v111_v36  ;;  %v413_v13 = vmax.f32 %v154_v10, %v1579_v41 }
  0x6e   :  { %275 = vst [vmem:[#allocation1 + $0x10] ss:$2 sm:$0xff] %v112_v39 }
  0x6f   :  { %276 = vst [vmem:[#allocation1 + $0x20] ss:$2 sm:$0xff] %v113_v42 }
  0x70   :  { %277 = vst [vmem:[#allocation1 + $0x30] ss:$2 sm:$0xff] %v114_v49 }
  0x71   :  { %450 = vst [vmem:[#allocation2 + $0xb0] sm:$0xf] %v386_v51 }
  0x72   :  { %451 = vst [vmem:[#allocation2 + $0x1b0] sm:$0xf] %v387_v53 }
  0x73   :  { %452 = vst [vmem:[#allocation2 + $0xd8] sm:$0xf] %v388_v0 }
  0x74   :  { %453 = vst [vmem:[#allocation2 + $0x18] sm:$0xf] %v389_v56  ;;  %v1620_v10 = vld.sshfl [vmem:[#allocation1 + $0x8] sm:$0xff pattern:$0x75316420] }
  0x75   :  { %454 = vst [vmem:[#allocation2 + $0x50] sm:$0xf] %v390_v58 }
  0x76   :  { %455 = vst [vmem:[#allocation2 + $0x168] sm:$0xf] %v391_v60 }
  0x77   :  { %456 = vst [vmem:[#allocation2 + $0x130] sm:$0xf] %v392_v61 }
  0x78   :  { %457 = vst [vmem:[#allocation2 + $0x48] sm:$0xf] %v393_v62  ;;  %v517_v4 = vld [vmem:[#allocation2 + $0xb0] sm:$0xff]  ;;  %v1618_v62 = vld.sshfl [vmem:[#allocation1] sm:$0xff pattern:$0x75316420] }
  0x79   :  { %474 = vst [vmem:[#allocation2 + $0x1e8] sm:$0xf] %v410_v63  ;;  %v518_v16 = vld [vmem:[#allocation2 + $0x1b0] sm:$0xff]  ;;  %v581_v6 = vrot.slane %v517_v4, 4 }
  0x7a   :  { %475 = vst [vmem:[#allocation2 + $0xf8] sm:$0xf] %v411_v1  ;;  %v519_v15 = vld [vmem:[#allocation2 + $0xd8] sm:$0xff]  ;;  %v587_v17 = vrot.slane %v518_v16, 4 }
  0x7b   :  { %476 = vst [vmem:[#allocation2 + $0x160] sm:$0xf] %v412_v2  ;;  %v520_v19 = vld [vmem:[#allocation2 + $0x18] sm:$0xff]  ;;  %v582_v20 = vmax.f32 %v517_v4, %v581_v6  ;;  %v593_v21 = vrot.slane %v519_v15, 4 }
  0x7c   :  { %477 = vst [vmem:[#allocation2 + $0x30] sm:$0xf] %v413_v13  ;;  %v521_v23 = vld [vmem:[#allocation2 + $0x50] sm:$0xff]  ;;  %v588_v24 = vmax.f32 %v518_v16, %v587_v17  ;;  %v599_v25 = vrot.slane %v520_v19, 4 }
  0x7d   :  { %478 = vst [vmem:[#allocation2 + $0x1e0] sm:$0xf] %v414_v5  ;;  %v522_v26 = vld [vmem:[#allocation2 + $0x168] sm:$0xff]  ;;  %v583_v27 = vrot.slane %v582_v20, 2  ;;  %v594_v28 = vmax.f32 %v519_v15, %v593_v21  ;;  %v605_v30 = vrot.slane %v521_v23, 4 }
  0x7e   :  { %479 = vst [vmem:[#allocation2] sm:$0xf] %v415_v8  ;;  %v523_v31 = vld [vmem:[#allocation2 + $0x130] sm:$0xff]  ;;  %v589_v32 = vrot.slane %v588_v24, 2  ;;  %v600_v29 = vmax.f32 %v520_v19, %v599_v25  ;;  %v611_v36 = vrot.slane %v522_v26, 4  ;;  %v117_v15 = vld [vmem:[%s1813_s0 + $0xb0] sm:$0xff] }
  0x7f   :  { %480 = vst [vmem:[#allocation2 + $0xf0] sm:$0xf] %v416_v18  ;;  %v524_v37 = vld [vmem:[#allocation2 + $0x48] sm:$0xff]  ;;  %v584_v38 = vmax.f32 %v582_v20, %v583_v27  ;;  %v595_v39 = vrot.slane %v594_v28, 2  ;;  %v606_v35 = vmax.f32 %v521_v23, %v605_v30  ;;  %v617_v40 = vrot.slane %v523_v31, 4 }
  0x80   :  { %481 = vst [vmem:[#allocation2 + $0x8] sm:$0xf] %v417_v22  ;;  %v590_v41 = vmax.f32 %v588_v24, %v589_v32  ;;  %v601_v42 = vrot.slane %v600_v29, 2  ;;  %v612_v43 = vmax.f32 %v522_v26, %v611_v36  ;;  %v623_v44 = vrot.slane %v524_v37, 4  ;;  %v541_v49 = vld [vmem:[#allocation2 + $0x1e8] sm:$0xff] }
  0x81   :  { %v585_v45 = vrot.slane %v584_v38, 1  ;;  %v596_v46 = vmax.f32 %v594_v28, %v595_v39  ;;  %v607_v47 = vrot.slane %v606_v35, 2  ;;  %v618_v48 = vmax.f32 %v523_v31, %v617_v40  ;;  %v542_v54 = vld [vmem:[#allocation2 + $0xf8] sm:$0xff]  ;;  %v1627_v13 = vld.sshfl [vmem:[#allocation1 + $0x10] sm:$0xff pattern:$0x75316420] }
  0x82   :  { %v591_v50 = vrot.slane %v590_v41, 1  ;;  %v602_v51 = vmax.f32 %v600_v29, %v601_v42  ;;  %v613_v52 = vrot.slane %v612_v43, 2  ;;  %v624_v53 = vmax.f32 %v524_v37, %v623_v44  ;;  %v543_v58 = vld [vmem:[#allocation2 + $0x160] sm:$0xff]  ;;  %v1629_v4 = vld.sshfl [vmem:[#allocation1 + $0x18] sm:$0xff pattern:$0x75316420] }
  0x83   :  { %v1611_v0 = vmax.f32 %v584_v38, %v585_v45  ;;  %v597_v55 = vrot.slane %v596_v46, 1  ;;  %v608_v56 = vmax.f32 %v606_v35, %v607_v47  ;;  %v619_v57 = vrot.slane %v618_v48, 2  ;;  %v544_v63 = vld [vmem:[#allocation2 + $0x30] sm:$0xff]  ;;  %v1636_v17 = vld.sshfl [vmem:[#allocation1 + $0x20] sm:$0xff pattern:$0x75316420] }
  0x84   :  { %v1613_v59 = vmax.f32 %v590_v41, %v591_v50  ;;  %v603_v60 = vrot.slane %v602_v51, 1  ;;  %v614_v7 = vmax.f32 %v612_v43, %v613_v52  ;;  %v625_v61 = vrot.slane %v624_v53, 2  ;;  %v545_v14 = vld [vmem:[#allocation2 + $0x1e0] sm:$0xff]  ;;  %v1642_v24 = vld.sshfl [vmem:[#allocation1 + $0x30] sm:$0xff pattern:$0x75316420] }
  0x85   :  { %v1622_v11 = vmax.f32 %v596_v46, %v597_v55  ;;  %v609_v1 = vrot.slane %v608_v56, 1  ;;  %v620_v12 = vmax.f32 %v618_v48, %v619_v57  ;;  %v725_v2 = vrot.slane %v541_v49, 4  ;;  %v1638_v18 = vld.sshfl [vmem:[#allocation1 + $0x28] sm:$0xff pattern:$0x75316420]  ;;  %v118_v39 = vld [vmem:[%s1813_s0 + $0xb8] sm:$0xff] }
  0x86   :  { %v1631_v5 = vmax.f32 %v602_v51, %v603_v60  ;;  %v615_v16 = vrot.slane %v614_v7, 1  ;;  %v626_v6 = vmax.f32 %v624_v53, %v625_v61  ;;  %v731_v8 = vrot.slane %v542_v54, 4  ;;  %v546_v19 = vld [vmem:[#allocation2] sm:$0xff]  ;;  %v547_v25 = vld [vmem:[#allocation2 + $0xf0] sm:$0xff]  ;;  %286 = vst [vmem:[#allocation1] ss:$2 sm:$0xff] %v115_v9 }
  0x87   :  { %v1640_v20 = vmax.f32 %v608_v56, %v609_v1  ;;  %v621_v21 = vrot.slane %v620_v12, 1  ;;  %v726_v22 = vmax.f32 %v541_v49, %v725_v2  ;;  %v737_v23 = vrot.slane %v543_v58, 4  ;;  %v1646_v31 = vld.sshfl [vmem:[#allocation1 + $0x38] sm:$0xff pattern:$0x75316420]  ;;  %v548_v32 = vld [vmem:[#allocation2 + $0x8] sm:$0xff] }
  0x88   :  { %v1644_v26 = vmax.f32 %v614_v7, %v615_v16  ;;  %v627_v27 = vrot.slane %v626_v6, 1  ;;  %v732_v28 = vmax.f32 %v542_v54, %v731_v8  ;;  %v743_v30 = vrot.slane %v544_v63, 4  ;;  %287 = vst [vmem:[#allocation1 + $0x10] ss:$2 sm:$0xff] %v116_v3  ;;  %v160_v1 = vld [vmem:[#allocation2 + $0x1d0] sm:$0xf] }
  0x89   :  { %v1648_v29 = vmax.f32 %v620_v12, %v621_v21  ;;  %v727_v36 = vrot.slane %v726_v22, 2  ;;  %v738_v37 = vmax.f32 %v543_v58, %v737_v23  ;;  %v749_v38 = vrot.slane %v545_v14, 4  ;;  %288 = vst [vmem:[#allocation1 + $0x20] ss:$2 sm:$0xff] %v117_v15  ;;  %v119_v12 = vld [vmem:[%s1813_s0 + $0xc0] sm:$0xff] }
  0x8a   :  { %v1653_v35 = vmax.f32 %v626_v6, %v627_v27  ;;  %v733_v40 = vrot.slane %v732_v28, 2  ;;  %v744_v41 = vmax.f32 %v544_v63, %v743_v30  ;;  %v755_v42 = vrot.slane %v546_v19, 4  ;;  %289 = vst [vmem:[#allocation1 + $0x30] ss:$2 sm:$0xff] %v118_v39  ;;  %v159_v63 = vld [vmem:[#allocation2 + $0x148] sm:$0xf] }
  0x8b   :  { %v728_v43 = vmax.f32 %v726_v22, %v727_v36  ;;  %v739_v44 = vrot.slane %v738_v37, 2  ;;  %v750_v45 = vmax.f32 %v545_v14, %v749_v38  ;;  %v761_v46 = vrot.slane %v547_v25, 4  ;;  %v161_v22 = vld [vmem:[#allocation2 + $0x100] sm:$0xf]  ;;  %v162_v23 = vld [vmem:[#allocation2 + $0xc8] sm:$0xf] }
  0x8c   :  { %v734_v47 = vmax.f32 %v732_v28, %v733_v40  ;;  %v745_v48 = vrot.slane %v744_v41, 2  ;;  %v756_v49 = vmax.f32 %v546_v19, %v755_v42  ;;  %v767_v50 = vrot.slane %v548_v32, 4  ;;  %v120_v27 = vld [vmem:[%s1813_s0 + $0xc8] sm:$0xff] }
  0x8d   :  { %v729_v51 = vrot.slane %v728_v43, 1  ;;  %v740_v52 = vmax.f32 %v738_v37, %v739_v44  ;;  %v751_v53 = vrot.slane %v750_v45, 2  ;;  %v762_v54 = vmax.f32 %v547_v25, %v761_v46  ;;  %v1658_v6 = vld.sshfl [vmem:[#allocation1] sm:$0xff pattern:$0x75316420] }
  0x8e   :  { %v735_v55 = vrot.slane %v734_v47, 1  ;;  %v746_v56 = vmax.f32 %v744_v41, %v745_v48  ;;  %v757_v57 = vrot.slane %v756_v49, 2  ;;  %v768_v58 = vmax.f32 %v548_v32, %v767_v50  ;;  %v1662_v25 = vld.sshfl [vmem:[#allocation1 + $0x8] sm:$0xff pattern:$0x75316420] }
  0x8f   :  { %v730_v60 = vmax.f32 %v728_v43, %v729_v51  ;;  %v741_v7 = vrot.slane %v740_v52, 1  ;;  %v752_v61 = vmax.f32 %v750_v45, %v751_v53  ;;  %v763_v9 = vrot.slane %v762_v54, 2  ;;  %v1669_v37 = vld.sshfl [vmem:[#allocation1 + $0x10] sm:$0xff pattern:$0x75316420] }
  0x90   :  { %v736_v2 = vmax.f32 %v734_v47, %v735_v55  ;;  %v747_v3 = vrot.slane %v746_v56, 1  ;;  %v758_v14 = vmax.f32 %v756_v49, %v757_v57  ;;  %v769_v16 = vrot.slane %v768_v58, 2  ;;  %298 = vst [vmem:[#allocation1] ss:$2 sm:$0xff] %v119_v12  ;;  %v163_v40 = vld [vmem:[#allocation2 + $0x40] sm:$0xf] }
  0x91   :  { %v742_v8 = vmax.f32 %v740_v52, %v741_v7  ;;  %v753_v15 = vrot.slane %v752_v61, 1  ;;  %v764_v19 = vmax.f32 %v762_v54, %v763_v9  ;;  %v965_v21 = vmax.f32 %v1611_v0, %v1640_v20  ;;  %v1675_v41 = vld.sshfl [vmem:[#allocation1 + $0x18] sm:$0xff pattern:$0x75316420]  ;;  %v164_v44 = vld [vmem:[#allocation2 + $0x1f8] sm:$0xf] }
  0x92   :  { %v748_v28 = vmax.f32 %v746_v56, %v747_v3  ;;  %v759_v30 = vrot.slane %v758_v14, 1  ;;  %v770_v32 = vmax.f32 %v768_v58, %v769_v16  ;;  %v966_v36 = vmax.f32 %v1613_v59, %v1644_v26  ;;  %299 = vst [vmem:[#allocation1 + $0x10] ss:$2 sm:$0xff] %v120_v27  ;;  %v165_v49 = vld [vmem:[#allocation2 + $0x20] sm:$0xf] }
  0x93   :  { %v754_v38 = vmax.f32 %v752_v61, %v753_v15  ;;  %v765_v39 = vrot.slane %v764_v19, 1  ;;  %v967_v0 = vmax.f32 %v1622_v11, %v1648_v29  ;;  %v968_v20 = vmax.f32 %v1631_v5, %v1653_v35  ;;  %v166_v50 = vld [vmem:[#allocation2 + $0x128] sm:$0xf]  ;;  %v167_v52 = vld [vmem:[#allocation2 + $0x1a0] sm:$0xf] }
  0x94   :  { %v760_v42 = vmax.f32 %v758_v14, %v759_v30  ;;  %v771_v43 = vrot.slane %v770_v32, 1  ;;  %v418_v45 = vmax.f32 %v159_v63, %v1618_v62  ;;  %v419_v59 = vmax.f32 %v160_v1, %v1620_v10  ;;  %v168_v54 = vld [vmem:[#allocation2 + $0x1f0] sm:$0xf]  ;;  %v169_v55 = vld [vmem:[#allocation2 + $0xe8] sm:$0xf] }
  0x95   :  { %v766_v26 = vmax.f32 %v764_v19, %v765_v39  ;;  %v977_v46 = vmax.f32 %v730_v60, %v754_v38  ;;  %v997_v47 = vmax.f32 %v965_v21, %v967_v0  ;;  %v998_v48 = vmax.f32 %v966_v36, %v968_v20  ;;  %v170_v58 = vld [vmem:[#allocation2 + $0x78] sm:$0xf]  ;;  %v171_v60 = vld [vmem:[#allocation2 + $0x70] sm:$0xf] }
  0x96   :  { %v772_v11 = vmax.f32 %v770_v32, %v771_v43  ;;  %v978_v29 = vmax.f32 %v736_v2, %v760_v42  ;;  %v420_v5 = vmax.f32 %v161_v22, %v1627_v13  ;;  %v421_v35 = vmax.f32 %v162_v23, %v1629_v4  ;;  %482 = vst [vmem:[#allocation2 + $0x148] sm:$0xf] %v418_v45  ;;  %v172_v61 = vld [vmem:[#allocation2 + $0x90] sm:$0xf]  ;;  %v173_v9 = vld [vmem:[#allocation2 + $0x1d8] sm:$0xf] }
  0x97   :  { %v979_v51 = vmax.f32 %v742_v8, %v766_v26  ;;  %v422_v62 = vmax.f32 %v163_v40, %v1636_v17  ;;  %v423_v10 = vmax.f32 %v164_v44, %v1638_v18  ;;  %483 = vst [vmem:[#allocation2 + $0x1d0] sm:$0xf] %v419_v59  ;;  %v424_v56 = vmax.f32 %v165_v49, %v1642_v24  ;;  %v294_v17 = vld.sshfl [vmem:[#allocation1 + $0x20] sm:$0xff pattern:$0x75316420]  ;;  %v121_v45 = vld [vmem:[%s1813_s0 + $0xd0] sm:$0xff] }
  0x98   :  { %v980_v53 = vmax.f32 %v748_v28, %v772_v11  ;;  %484 = vst [vmem:[#allocation2 + $0x100] sm:$0xf] %v420_v5  ;;  %v425_v13 = vmax.f32 %v166_v50, %v1646_v31  ;;  %v1685_v7 = vmax.f32 %v997_v47, %v998_v48  ;;  %v426_v18 = vmax.f32 %v167_v52, %v1658_v6  ;;  %v295_v63 = vld.sshfl [vmem:[#allocation1 + $0x28] sm:$0xff pattern:$0x75316420]  ;;  %v122_v49 = vld [vmem:[%s1813_s0 + $0xd8] sm:$0xff] }
  0x99   :  { %v1003_v57 = vmax.f32 %v977_v46, %v979_v51  ;;  %485 = vst [vmem:[#allocation2 + $0xc8] sm:$0xf] %v421_v35  ;;  %v427_v1 = vmax.f32 %v168_v54, %v1662_v25  ;;  %v296_v12 = vld.sshfl [vmem:[#allocation1 + $0x30] sm:$0xff pattern:$0x75316420]  ;;  %v428_v2 = vmax.f32 %v169_v55, %v1669_v37  ;;  %v429_v3 = vmax.f32 %v170_v58, %v1675_v41 }
  0x9a   :  { %v1004_v4 = vmax.f32 %v978_v29, %v980_v53  ;;  %486 = vst [vmem:[#allocation2 + $0x40] sm:$0xf] %v422_v62  ;;  %v297_v31 = vld.sshfl [vmem:[#allocation1 + $0x38] sm:$0xff pattern:$0x75316420]  ;;  %v430_v8 = vmax.f32 %v171_v60, %v294_v17  ;;  %v431_v21 = vmax.f32 %v172_v61, %v295_v63  ;;  %v432_v25 = vmax.f32 %v173_v9, %v296_v12 }
  0x9b   :  { %487 = vst [vmem:[#allocation2 + $0x1f8] sm:$0xf] %v423_v10  ;;  %v174_v6 = vld [vmem:[#allocation2 + $0xd0] sm:$0xf] }
  0x9c   :  { %v1689_v24 = vmax.f32 %v1003_v57, %v1004_v4  ;;  %488 = vst [vmem:[#allocation2 + $0x20] sm:$0xf] %v424_v56  ;;  %v433_v32 = vmax.f32 %v174_v6, %v297_v31  ;;  %v123_v57 = vld [vmem:[%s1813_s0 + $0xe0] sm:$0xff] }
  0x9d   :  { %489 = vst [vmem:[#allocation2 + $0x128] sm:$0xf] %v425_v13  ;;  %v549_v14 = vld [vmem:[#allocation2 + $0x148] sm:$0xff]  ;;  %v1707_v17 = vld.sshfl [vmem:[#allocation1] sm:$0xff pattern:$0x75316420] }
  0x9e   :  { %v1296_v16 = vpack.i.bf16 %v1689_v24, %v1685_v7  ;;  %490 = vst [vmem:[#allocation2 + $0x1a0] sm:$0xf] %v426_v18  ;;  %v550_v15 = vld [vmem:[#allocation2 + $0x1d0] sm:$0xff]  ;;  %v773_v19 = vrot.slane %v549_v14, 4 }
  0x9f   :  { %491 = vst [vmem:[#allocation2 + $0x1f0] sm:$0xf] %v427_v1  ;;  %v551_v22 = vld [vmem:[#allocation2 + $0x100] sm:$0xff]  ;;  %v779_v23 = vrot.slane %v550_v15, 4 }
  0xa0   :  { %1297 = vrot.lane.b32.xlu0 %v1296_v16, %s1381_s10  ;;  %492 = vst [vmem:[#allocation2 + $0xe8] sm:$0xf] %v428_v2  ;;  %v552_v27 = vld [vmem:[#allocation2 + $0xc8] sm:$0xff]  ;;  %v774_v28 = vmax.f32 %v549_v14, %v773_v19  ;;  %v785_v30 = vrot.slane %v551_v22, 4 }
  0xa1   :  { %493 = vst [vmem:[#allocation2 + $0x78] sm:$0xf] %v429_v3  ;;  %v553_v36 = vld [vmem:[#allocation2 + $0x40] sm:$0xff]  ;;  %v780_v37 = vmax.f32 %v550_v15, %v779_v23  ;;  %v791_v38 = vrot.slane %v552_v27, 4 }
  0xa2   :  { %494 = vst [vmem:[#allocation2 + $0x70] sm:$0xf] %v430_v8  ;;  %v554_v39 = vld [vmem:[#allocation2 + $0x1f8] sm:$0xff]  ;;  %v775_v0 = vrot.slane %v774_v28, 2  ;;  %v786_v20 = vmax.f32 %v551_v22, %v785_v30  ;;  %v797_v40 = vrot.slane %v553_v36, 4 }
  0xa3   :  { %495 = vst [vmem:[#allocation2 + $0x90] sm:$0xf] %v431_v21  ;;  %v555_v41 = vld [vmem:[#allocation2 + $0x20] sm:$0xff]  ;;  %v781_v42 = vrot.slane %v780_v37, 2  ;;  %v792_v43 = vmax.f32 %v552_v27, %v791_v38  ;;  %v803_v44 = vrot.slane %v554_v39, 4 }
  0xa4   :  { %496 = vst [vmem:[#allocation2 + $0x1d8] sm:$0xf] %v432_v25  ;;  %v556_v59 = vld [vmem:[#allocation2 + $0x128] sm:$0xff]  ;;  %v776_v26 = vmax.f32 %v774_v28, %v775_v0  ;;  %v787_v46 = vrot.slane %v786_v20, 2  ;;  %v798_v47 = vmax.f32 %v553_v36, %v797_v40  ;;  %v809_v48 = vrot.slane %v555_v41, 4 }
  0xa5   :  { %497 = vst [vmem:[#allocation2 + $0xd0] sm:$0xf] %v433_v32  ;;  %v782_v11 = vmax.f32 %v780_v37, %v781_v42  ;;  %v793_v29 = vrot.slane %v792_v43, 2  ;;  %v804_v50 = vmax.f32 %v554_v39, %v803_v44  ;;  %v815_v5 = vrot.slane %v556_v59, 4  ;;  %v557_v10 = vld [vmem:[#allocation2 + $0x1a0] sm:$0xff] }
  0xa6   :  { %v777_v35 = vrot.slane %v776_v26, 1  ;;  %v788_v51 = vmax.f32 %v786_v20, %v787_v46  ;;  %v799_v52 = vrot.slane %v798_v47, 2  ;;  %v810_v62 = vmax.f32 %v555_v41, %v809_v48  ;;  %300 = vst [vmem:[#allocation1 + $0x20] ss:$2 sm:$0xff] %v121_v45  ;;  %v558_v58 = vld [vmem:[#allocation2 + $0x1f0] sm:$0xff]  ;;  %v124_v32 = vld [vmem:[%s1813_s0 + $0xe8] sm:$0xff] }
  0xa7   :  { %v783_v53 = vrot.slane %v782_v11, 1  ;;  %v794_v54 = vmax.f32 %v792_v43, %v793_v29  ;;  %v805_v55 = vrot.slane %v804_v50, 2  ;;  %v816_v56 = vmax.f32 %v556_v59, %v815_v5  ;;  %301 = vst [vmem:[#allocation1 + $0x30] ss:$2 sm:$0xff] %v122_v49  ;;  %v559_v18 = vld [vmem:[#allocation2 + $0xe8] sm:$0xff] }
  0xa8   :  { %v1705_v60 = vmax.f32 %v776_v26, %v777_v35  ;;  %v789_v13 = vrot.slane %v788_v51, 1  ;;  %v800_v4 = vmax.f32 %v798_v47, %v799_v52  ;;  %v811_v61 = vrot.slane %v810_v62, 2  ;;  %v1711_v2 = vld.sshfl [vmem:[#allocation1 + $0x8] sm:$0xff pattern:$0x75316420]  ;;  %v560_v31 = vld [vmem:[#allocation2 + $0x78] sm:$0xff] }
  0xa9   :  { %v1709_v9 = vmax.f32 %v782_v11, %v783_v53  ;;  %v795_v63 = vrot.slane %v794_v54, 1  ;;  %v806_v1 = vmax.f32 %v804_v50, %v805_v55  ;;  %v817_v12 = vrot.slane %v816_v56, 2  ;;  %v561_v8 = vld [vmem:[#allocation2 + $0x70] sm:$0xff]  ;;  %v1722_v36 = vld.sshfl [vmem:[#allocation1 + $0x10] sm:$0xff pattern:$0x75316420] }
  0xaa   :  { %v1713_v3 = vmax.f32 %v788_v51, %v789_v13  ;;  %v801_v14 = vrot.slane %v800_v4, 1  ;;  %v812_v16 = vmax.f32 %v810_v62, %v811_v61  ;;  %v821_v6 = vrot.slane %v557_v10, 4  ;;  %v562_v23 = vld [vmem:[#allocation2 + $0x90] sm:$0xff]  ;;  %310 = vst [vmem:[#allocation1] ss:$2 sm:$0xff] %v123_v57  ;;  %v125_v11 = vld [vmem:[%s1813_s0 + $0xf0] sm:$0xff] }
  0xab   :  { %v1715_v15 = vmax.f32 %v794_v54, %v795_v63  ;;  %v807_v19 = vrot.slane %v806_v1, 1  ;;  %v818_v21 = vmax.f32 %v816_v56, %v817_v12  ;;  %v827_v22 = vrot.slane %v558_v58, 4  ;;  %v1724_v37 = vld.sshfl [vmem:[#allocation1 + $0x18] sm:$0xff pattern:$0x75316420]  ;;  %v563_v38 = vld [vmem:[#allocation2 + $0x1d8] sm:$0xff] }
  0xac   :  { %v1717_v25 = vmax.f32 %v800_v4, %v801_v14  ;;  %v813_v27 = vrot.slane %v812_v16, 1  ;;  %v822_v28 = vmax.f32 %v557_v10, %v821_v6  ;;  %v833_v30 = vrot.slane %v559_v18, 4  ;;  %v564_v42 = vld [vmem:[#allocation2 + $0xd0] sm:$0xff]  ;;  %311 = vst [vmem:[#allocation1 + $0x10] ss:$2 sm:$0xff] %v124_v32 }
  0xad   :  { %v1726_v39 = vmax.f32 %v806_v1, %v807_v19  ;;  %v819_v0 = vrot.slane %v818_v21, 1  ;;  %v828_v20 = vmax.f32 %v558_v58, %v827_v22  ;;  %v839_v40 = vrot.slane %v560_v31, 4  ;;  %v1728_v41 = vld.sshfl [vmem:[#allocation1 + $0x20] sm:$0xff pattern:$0x75316420]  ;;  %v126_v52 = vld [vmem:[%s1813_s0 + $0xf8] sm:$0xff] }
  0xae   :  { %v1730_v43 = vmax.f32 %v812_v16, %v813_v27  ;;  %v823_v44 = vrot.slane %v822_v28, 2  ;;  %v834_v45 = vmax.f32 %v559_v18, %v833_v30  ;;  %v845_v59 = vrot.slane %v561_v8, 4  ;;  %v1732_v26 = vld.sshfl [vmem:[#allocation1 + $0x28] sm:$0xff pattern:$0x75316420]  ;;  %s1382_s0 = smov 96  }
  0xaf   :  { %v820_v46 = vmax.f32 %v818_v21, %v819_v0  ;;  %v829_v47 = vrot.slane %v828_v20, 2  ;;  %v840_v48 = vmax.f32 %v560_v31, %v839_v40  ;;  %v851_v49 = vrot.slane %v562_v23, 4  ;;  %v1737_v29 = vld.sshfl [vmem:[#allocation1 + $0x30] sm:$0xff pattern:$0x75316420] }
  0xb0   :  { %v824_v50 = vmax.f32 %v822_v28, %v823_v44  ;;  %v835_v5 = vrot.slane %v834_v45, 2  ;;  %v846_v35 = vmax.f32 %v561_v8, %v845_v59  ;;  %v857_v51 = vrot.slane %v563_v38, 4  ;;  %v1742_v62 = vld.sshfl [vmem:[#allocation1 + $0x38] sm:$0xff pattern:$0x75316420] }
  0xb1   :  { %v830_v10 = vmax.f32 %v828_v20, %v829_v47  ;;  %v841_v53 = vrot.slane %v840_v48, 2  ;;  %v852_v54 = vmax.f32 %v562_v23, %v851_v49  ;;  %v863_v55 = vrot.slane %v564_v42, 4  ;;  %312 = vst [vmem:[#allocation1 + $0x20] ss:$2 sm:$0xff] %v125_v11  ;;  %v175_v28 = vld [vmem:[#allocation2 + $0xb8] sm:$0xf] }
  0xb2   :  { %v825_v56 = vrot.slane %v824_v50, 1  ;;  %v836_v57 = vmax.f32 %v834_v45, %v835_v5  ;;  %v847_v58 = vrot.slane %v846_v35, 2  ;;  %v858_v13 = vmax.f32 %v563_v38, %v857_v51  ;;  %313 = vst [vmem:[#allocation1 + $0x30] ss:$2 sm:$0xff] %v126_v52  ;;  %v176_v30 = vld [vmem:[#allocation2 + $0x88] sm:$0xf] }
  0xb3   :  { %v831_v4 = vrot.slane %v830_v10, 1  ;;  %v842_v61 = vmax.f32 %v840_v48, %v841_v53  ;;  %v853_v18 = vrot.slane %v852_v54, 2  ;;  %v864_v63 = vmax.f32 %v564_v42, %v863_v55  ;;  %v177_v59 = vld [vmem:[#allocation2 + $0xa8] sm:$0xf] }
  0xb4   :  { %v826_v1 = vmax.f32 %v824_v50, %v825_v56  ;;  %v837_v12 = vrot.slane %v836_v57, 1  ;;  %v848_v31 = vmax.f32 %v846_v35, %v847_v58  ;;  %v859_v14 = vrot.slane %v858_v13, 2  ;;  %v178_v47 = vld [vmem:[#allocation2 + $0x1c8] sm:$0xf]  ;;  %v185_v56 = vld [vmem:[#allocation2 + $0xc0] sm:$0xf] }
  0xb5   :  { %v832_v16 = vmax.f32 %v830_v10, %v831_v4  ;;  %v843_v6 = vrot.slane %v842_v61, 1  ;;  %v854_v8 = vmax.f32 %v852_v54, %v853_v18  ;;  %v865_v19 = vrot.slane %v864_v63, 2  ;;  %v181_v10 = vld [vmem:[#allocation2 + $0x68] sm:$0xf]  ;;  %v184_v54 = vld [vmem:[#allocation2 + $0x38] sm:$0xf] }
  0xb6   :  { %v838_v21 = vmax.f32 %v836_v57, %v837_v12  ;;  %v849_v22 = vrot.slane %v848_v31, 1  ;;  %v860_v23 = vmax.f32 %v858_v13, %v859_v14  ;;  %v981_v27 = vmax.f32 %v1705_v60, %v1717_v25  ;;  %v179_v60 = vld [vmem:[#allocation2 + $0x170] sm:$0xf]  ;;  %v314_v55 = vld.sshfl [vmem:[#allocation1] sm:$0xff pattern:$0x75316420] }
  0xb7   :  { %v844_v32 = vmax.f32 %v842_v61, %v843_v6  ;;  %v855_v38 = vrot.slane %v854_v8, 1  ;;  %v866_v0 = vmax.f32 %v864_v63, %v865_v19  ;;  %v982_v20 = vmax.f32 %v1709_v9, %v1726_v39  ;;  %v180_v39 = vld [vmem:[#allocation2 + $0x178] sm:$0xf]  ;;  %v315_v57 = vld.sshfl [vmem:[#allocation1 + $0x8] sm:$0xff pattern:$0x75316420] }
  0xb8   :  { %v850_v40 = vmax.f32 %v848_v31, %v849_v22  ;;  %v861_v42 = vrot.slane %v860_v23, 1  ;;  %v983_v44 = vmax.f32 %v1713_v3, %v1730_v43  ;;  %v984_v45 = vmax.f32 %v1715_v15, %v820_v46  ;;  %v182_v3 = vld [vmem:[#allocation2 + $0x190] sm:$0xf]  ;;  %v183_v43 = vld [vmem:[#allocation2 + $0x198] sm:$0xf] }
  0xb9   :  { %v856_v48 = vmax.f32 %v854_v8, %v855_v38  ;;  %v867_v49 = vrot.slane %v866_v0, 1  ;;  %v434_v25 = vmax.f32 %v175_v28, %v1707_v17  ;;  %v435_v11 = vmax.f32 %v176_v30, %v1711_v2  ;;  %v186_v4 = vld [vmem:[#allocation2 + $0x1c0] sm:$0xf]  ;;  %v316_v61 = vld.sshfl [vmem:[#allocation1 + $0x10] sm:$0xff pattern:$0x75316420] }
  0xba   :  { %v862_v50 = vmax.f32 %v860_v23, %v861_v42  ;;  %v985_v5 = vmax.f32 %v826_v1, %v850_v40  ;;  %v1005_v35 = vmax.f32 %v981_v27, %v983_v44  ;;  %v1006_v9 = vmax.f32 %v982_v20, %v984_v45  ;;  %v187_v63 = vld [vmem:[#allocation2 + $0x158] sm:$0xf]  ;;  %v317_v1 = vld.sshfl [vmem:[#allocation1 + $0x18] sm:$0xff pattern:$0x75316420] }
  0xbb   :  { %v868_v51 = vmax.f32 %v866_v0, %v867_v49  ;;  %v986_v52 = vmax.f32 %v832_v16, %v856_v48  ;;  %v436_v15 = vmax.f32 %v177_v59, %v1722_v36  ;;  %v437_v46 = vmax.f32 %v178_v47, %v1724_v37  ;;  %498 = vst [vmem:[#allocation2 + $0xb8] sm:$0xf] %v434_v25  ;;  %v188_v12 = vld [vmem:[#allocation2 + $0x10] sm:$0xf]  ;;  %v189_v16 = vld [vmem:[#allocation2 + $0x58] sm:$0xf] }
  0xbc   :  { %v987_v53 = vmax.f32 %v838_v21, %v862_v50  ;;  %v438_v17 = vmax.f32 %v179_v60, %v1728_v41  ;;  %v439_v58 = vmax.f32 %v180_v39, %v1732_v26  ;;  %499 = vst [vmem:[#allocation2 + $0x88] sm:$0xf] %v435_v11  ;;  %v440_v18 = vmax.f32 %v181_v10, %v1737_v29  ;;  %v318_v31 = vld.sshfl [vmem:[#allocation1 + $0x20] sm:$0xff pattern:$0x75316420] }
  0xbd   :  { %v988_v2 = vmax.f32 %v844_v32, %v868_v51  ;;  %500 = vst [vmem:[#allocation2 + $0xa8] sm:$0xf] %v436_v15  ;;  %v1758_v37 = vmax.f32 %v1005_v35, %v1006_v9  ;;  %v441_v41 = vmax.f32 %v182_v3, %v1742_v62  ;;  %v442_v14 = vmax.f32 %v183_v43, %v314_v55  ;;  %v319_v6 = vld.sshfl [vmem:[#allocation1 + $0x28] sm:$0xff pattern:$0x75316420] }
  0xbe   :  { %v1007_v13 = vmax.f32 %v985_v5, %v987_v53  ;;  %501 = vst [vmem:[#allocation2 + $0x1c8] sm:$0xf] %v437_v46  ;;  %v443_v8 = vmax.f32 %v184_v54, %v315_v57  ;;  %v320_v29 = vld.sshfl [vmem:[#allocation1 + $0x30] sm:$0xff pattern:$0x75316420]  ;;  %v444_v19 = vmax.f32 %v185_v56, %v316_v61  ;;  %v445_v23 = vmax.f32 %v186_v4, %v317_v1 }
  0xbf   :  { %v1008_v36 = vmax.f32 %v986_v52, %v988_v2  ;;  %502 = vst [vmem:[#allocation2 + $0x170] sm:$0xf] %v438_v17  ;;  %v321_v22 = vld.sshfl [vmem:[#allocation1 + $0x38] sm:$0xff pattern:$0x75316420]  ;;  %v446_v28 = vmax.f32 %v187_v63, %v318_v31  ;;  %v447_v38 = vmax.f32 %v188_v12, %v319_v6  ;;  %v448_v40 = vmax.f32 %v189_v16, %v320_v29 }
  0xc0   :  { %503 = vst [vmem:[#allocation2 + $0x178] sm:$0xf] %v439_v58  ;;  %v190_v27 = vld [vmem:[#allocation2 + $0xa0] sm:$0xf] }
  0xc1   :  { %v1761_v26 = vmax.f32 %v1007_v13, %v1008_v36  ;;  %504 = vst [vmem:[#allocation2 + $0x68] sm:$0xf] %v440_v18  ;;  %v449_v59 = vmax.f32 %v190_v27, %v321_v22 }
  0xc2   :  { %505 = vst [vmem:[#allocation2 + $0x190] sm:$0xf] %v441_v41  ;;  %v565_v62 = vld [vmem:[#allocation2 + $0xb8] sm:$0xff] }
  0xc3   :  { %v1301_v21 = vpack.i.bf16 %v1761_v26, %v1758_v37  ;;  %506 = vst [vmem:[#allocation2 + $0x198] sm:$0xf] %v442_v14  ;;  %v566_v30 = vld [vmem:[#allocation2 + $0x88] sm:$0xff]  ;;  %v869_v32 = vrot.slane %v565_v62, 4 }
  0xc4   :  { %507 = vst [vmem:[#allocation2 + $0x38] sm:$0xf] %v443_v8  ;;  %v567_v0 = vld [vmem:[#allocation2 + $0xa8] sm:$0xff]  ;;  %v875_v20 = vrot.slane %v566_v30, 4 }
  0xc5   :  { %1302 = vrot.lane.b32.xlu1 %v1301_v21, %s1381_s10  ;;  %508 = vst [vmem:[#allocation2 + $0xc0] sm:$0xf] %v444_v19  ;;  %v568_v42 = vld [vmem:[#allocation2 + $0x1c8] sm:$0xff]  ;;  %v870_v44 = vmax.f32 %v565_v62, %v869_v32  ;;  %v881_v45 = vrot.slane %v567_v0, 4 }
  0xc6   :  { %509 = vst [vmem:[#allocation2 + $0x1c0] sm:$0xf] %v445_v23  ;;  %v569_v47 = vld [vmem:[#allocation2 + $0x170] sm:$0xff]  ;;  %v876_v48 = vmax.f32 %v566_v30, %v875_v20  ;;  %v887_v49 = vrot.slane %v568_v42, 4 }
  0xc7   :  { %510 = vst [vmem:[#allocation2 + $0x158] sm:$0xf] %v446_v28  ;;  %v570_v60 = vld [vmem:[#allocation2 + $0x178] sm:$0xff]  ;;  %v871_v25 = vrot.slane %v870_v44, 2  ;;  %v882_v11 = vmax.f32 %v567_v0, %v881_v45  ;;  %v893_v50 = vrot.slane %v569_v47, 4 }
  0xc8   :  { %511 = vst [vmem:[#allocation2 + $0x10] sm:$0xf] %v447_v38  ;;  %v571_v5 = vld [vmem:[#allocation2 + $0x68] sm:$0xff]  ;;  %v877_v35 = vrot.slane %v876_v48, 2  ;;  %v888_v9 = vmax.f32 %v568_v42, %v887_v49  ;;  %v899_v39 = vrot.slane %v570_v60, 4 }
  0xc9   :  { %512 = vst [vmem:[#allocation2 + $0x58] sm:$0xf] %v448_v40  ;;  %v572_v51 = vld [vmem:[#allocation2 + $0x190] sm:$0xff]  ;;  %v872_v52 = vmax.f32 %v870_v44, %v871_v25  ;;  %v883_v10 = vrot.slane %v882_v11, 2  ;;  %v894_v3 = vmax.f32 %v569_v47, %v893_v50  ;;  %v905_v43 = vrot.slane %v571_v5, 4 }
  0xca   :  { %513 = vst [vmem:[#allocation2 + $0xa0] sm:$0xf] %v449_v59  ;;  %v878_v15 = vmax.f32 %v876_v48, %v877_v35  ;;  %v889_v46 = vrot.slane %v888_v9, 2  ;;  %v900_v53 = vmax.f32 %v570_v60, %v899_v39  ;;  %v911_v54 = vrot.slane %v572_v51, 4  ;;  %v573_v57 = vld [vmem:[#allocation2 + $0x198] sm:$0xff] }
  0xcb   :  { %v873_v55 = vrot.slane %v872_v52, 1  ;;  %v884_v17 = vmax.f32 %v882_v11, %v883_v10  ;;  %v895_v2 = vrot.slane %v894_v3, 2  ;;  %v906_v56 = vmax.f32 %v571_v5, %v905_v43  ;;  %v574_v18 = vld [vmem:[#allocation2 + $0x38] sm:$0xff] }
  0xcc   :  { %v879_v58 = vrot.slane %v878_v15, 1  ;;  %v890_v13 = vmax.f32 %v888_v9, %v889_v46  ;;  %v901_v4 = vrot.slane %v900_v53, 2  ;;  %v912_v61 = vmax.f32 %v572_v51, %v911_v54  ;;  %v575_v12 = vld [vmem:[#allocation2 + $0xc0] sm:$0xff] }
  0xcd   :  { %v1766_v36 = vmax.f32 %v872_v52, %v873_v55  ;;  %v885_v63 = vrot.slane %v884_v17, 1  ;;  %v896_v1 = vmax.f32 %v894_v3, %v895_v2  ;;  %v907_v41 = vrot.slane %v906_v56, 2  ;;  %v576_v8 = vld [vmem:[#allocation2 + $0x1c0] sm:$0xff] }
  0xce   :  { %v1768_v31 = vmax.f32 %v878_v15, %v879_v58  ;;  %v891_v14 = vrot.slane %v890_v13, 1  ;;  %v902_v16 = vmax.f32 %v900_v53, %v901_v4  ;;  %v913_v6 = vrot.slane %v912_v61, 2  ;;  %v577_v23 = vld [vmem:[#allocation2 + $0x158] sm:$0xff] }
  0xcf   :  { %v1770_v29 = vmax.f32 %v884_v17, %v885_v63  ;;  %v897_v19 = vrot.slane %v896_v1, 1  ;;  %v908_v21 = vmax.f32 %v906_v56, %v907_v41  ;;  %v917_v22 = vrot.slane %v573_v57, 4  ;;  %v578_v32 = vld [vmem:[#allocation2 + $0x10] sm:$0xff] }
  0xd0   :  { %v1772_v62 = vmax.f32 %v890_v13, %v891_v14  ;;  %v903_v27 = vrot.slane %v902_v16, 1  ;;  %v914_v28 = vmax.f32 %v912_v61, %v913_v6  ;;  %v923_v30 = vrot.slane %v574_v18, 4  ;;  %v579_v42 = vld [vmem:[#allocation2 + $0x58] sm:$0xff] }
  0xd1   :  { %v898_v38 = vmax.f32 %v896_v1, %v897_v19  ;;  %v909_v0 = vrot.slane %v908_v21, 1  ;;  %v918_v20 = vmax.f32 %v573_v57, %v917_v22  ;;  %v929_v40 = vrot.slane %v575_v12, 4  ;;  %v580_v48 = vld [vmem:[#allocation2 + $0xa0] sm:$0xff] }
  0xd2   :  { %v904_v44 = vmax.f32 %v902_v16, %v903_v27  ;;  %v915_v45 = vrot.slane %v914_v28, 1  ;;  %v924_v59 = vmax.f32 %v574_v18, %v923_v30  ;;  %v935_v47 = vrot.slane %v576_v8, 4  ;;  %v1293_v19 = vpop.permute.xlu0 %1292 }
  0xd3   :  { %v910_v49 = vmax.f32 %v908_v21, %v909_v0  ;;  %v919_v60 = vrot.slane %v918_v20, 2  ;;  %v930_v25 = vmax.f32 %v575_v12, %v929_v40  ;;  %v941_v11 = vrot.slane %v577_v23, 4 }
  0xd4   :  { %v916_v50 = vmax.f32 %v914_v28, %v915_v45  ;;  %v925_v5 = vrot.slane %v924_v59, 2  ;;  %v936_v35 = vmax.f32 %v576_v8, %v935_v47  ;;  %v947_v9 = vrot.slane %v578_v32, 4 }
  0xd5   :  { %v920_v39 = vmax.f32 %v918_v20, %v919_v60  ;;  %v931_v51 = vrot.slane %v930_v25, 2  ;;  %v942_v52 = vmax.f32 %v577_v23, %v941_v11  ;;  %v953_v10 = vrot.slane %v579_v42, 4 }
  0xd6   :  { %v926_v3 = vmax.f32 %v924_v59, %v925_v5  ;;  %v937_v43 = vrot.slane %v936_v35, 2  ;;  %v948_v15 = vmax.f32 %v578_v32, %v947_v9  ;;  %v959_v46 = vrot.slane %v580_v48, 4 }
  0xd7   :  { %v921_v53 = vrot.slane %v920_v39, 1  ;;  %v932_v54 = vmax.f32 %v930_v25, %v931_v51  ;;  %v943_v55 = vrot.slane %v942_v52, 2  ;;  %v954_v17 = vmax.f32 %v579_v42, %v953_v10 }
  0xd8   :  { %v927_v2 = vrot.slane %v926_v3, 1  ;;  %v938_v56 = vmax.f32 %v936_v35, %v937_v43  ;;  %v949_v57 = vrot.slane %v948_v15, 2  ;;  %v960_v58 = vmax.f32 %v580_v48, %v959_v46 }
  0xd9   :  { %v922_v13 = vmax.f32 %v920_v39, %v921_v53  ;;  %v933_v4 = vrot.slane %v932_v54, 1  ;;  %v944_v61 = vmax.f32 %v942_v52, %v943_v55  ;;  %v955_v18 = vrot.slane %v954_v17, 2 }
  0xda   :  { %v928_v63 = vmax.f32 %v926_v3, %v927_v2  ;;  %v939_v1 = vrot.slane %v938_v56, 1  ;;  %v950_v41 = vmax.f32 %v948_v15, %v949_v57  ;;  %v961_v12 = vrot.slane %v960_v58, 2 }
  0xdb   :  { %v934_v14 = vmax.f32 %v932_v54, %v933_v4  ;;  %v945_v16 = vrot.slane %v944_v61, 1  ;;  %v956_v6 = vmax.f32 %v954_v17, %v955_v18  ;;  %v989_v8 = vmax.f32 %v1766_v36, %v898_v38 }
  0xdc   :  { %v940_v21 = vmax.f32 %v938_v56, %v939_v1  ;;  %v951_v22 = vrot.slane %v950_v41, 1  ;;  %v962_v23 = vmax.f32 %v960_v58, %v961_v12  ;;  %v990_v27 = vmax.f32 %v1768_v31, %v904_v44 }
  0xdd   :  { %v946_v28 = vmax.f32 %v944_v61, %v945_v16  ;;  %v957_v30 = vrot.slane %v956_v6, 1  ;;  %v991_v32 = vmax.f32 %v1770_v29, %v910_v49  ;;  %v992_v0 = vmax.f32 %v1772_v62, %v916_v50 }
  0xde   :  { %v952_v20 = vmax.f32 %v950_v41, %v951_v22  ;;  %v963_v40 = vrot.slane %v962_v23, 1  ;;  %v1295_v42 = vunpack.i.h.bf16 %v1293_v19  ;;  %v1294_v45 = vunpack.i.l.bf16 %v1293_v19 }
  0xdf   :  { %v958_v59 = vmax.f32 %v956_v6, %v957_v30  ;;  %v993_v47 = vmax.f32 %v922_v13, %v946_v28  ;;  %v1009_v48 = vmax.f32 %v989_v8, %v991_v32  ;;  %v1010_v36 = vmax.f32 %v990_v27, %v992_v0  ;;  %v1142_v32 = vld [vmem:[%s1815_s2] sm:$0xff] }
  0xe0   :  { %v964_v38 = vmax.f32 %v962_v23, %v963_v40  ;;  %v994_v60 = vmax.f32 %v928_v63, %v952_v20  ;;  %v1054_v25 = vmax.f32 %v1552_v33, %v1294_v45  ;;  %v1055_v31 = vmax.f32 %v1556_v34, %v1295_v42 }
  0xe1   :  { %v995_v44 = vmax.f32 %v934_v14, %v958_v59  ;;  %v1019_v62 = vmax.f32 %v1009_v48, %v1010_v36  ;;  %v1384_v0 = vmov 0  }
  0xe2   :  { %v996_v11 = vmax.f32 %v940_v21, %v964_v38  ;;  %v1311_v5 = vpack.i.bf16 %v1055_v31, %v1054_v25  ;;  %1351 = vset.pattern.permute.xlu0 %v1384_v0  ;;  %1352 = vset.pattern.permute.xlu1 %v1384_v0 }
  0xe3   :  { %v1011_v29 = vmax.f32 %v993_v47, %v995_v44  ;;  %1353 = vset.pattern.permute.xlu2 %v1384_v0 }
  0xe4   :  { %v1012_v49 = vmax.f32 %v994_v60, %v996_v11  ;;  %1312 = vrot.lane.b32.xlu2 %v1311_v5, %s1382_s0 }
  0xe6   :  { %v1020_v50 = vmax.f32 %v1011_v29, %v1012_v49 }
  0xe8   :  { %v1306_v35 = vpack.i.bf16 %v1020_v50, %v1019_v62 }
  0xea   :  { %1307 = vrot.lane.b32.xlu1 %v1306_v35, %s1381_s10  ;;  %s1383_s10 = smov 112  }
 0x112   :  { %v1298_v9 = vpop.permute.xlu0 %1297 }
 0x113   :  { %v1300_v39 = vunpack.i.h.bf16 %v1298_v9  ;;  %v1299_v51 = vunpack.i.l.bf16 %v1298_v9 }
 0x115   :  { %v1056_v33 = vmax.f32 %v1689_v24, %v1300_v39  ;;  %v1053_v34 = vmax.f32 %v1685_v7, %v1299_v51 }
 0x117   :  { %v1316_v52 = vpack.i.bf16 %v1056_v33, %v1053_v34 }
 0x119   :  { %1317 = vrot.lane.b32.xlu2 %v1316_v52, %s1382_s0 }
 0x137   :  { %v1303_v10 = vpop.permute.xlu1 %1302 }
 0x138   :  { %v1305_v3 = vunpack.i.h.bf16 %v1303_v10  ;;  %v1304_v43 = vunpack.i.l.bf16 %v1303_v10 }
 0x13a   :  { %v1058_v15 = vmax.f32 %v1761_v26, %v1305_v3  ;;  %v1057_v46 = vmax.f32 %v1758_v37, %v1304_v43 }
 0x13c   :  { %v1321_v53 = vpack.i.bf16 %v1058_v15, %v1057_v46 }
 0x13e   :  { %1322 = vrot.lane.b32.xlu0 %v1321_v53, %s1382_s0  ;;  %v1313_v54 = vpop.permute.xlu2 %1312 }
 0x13f   :  { %v1315_v55 = vunpack.i.h.bf16 %v1313_v54  ;;  %v1314_v17 = vunpack.i.l.bf16 %v1313_v54 }
 0x141   :  { %v1095_v2 = vmax.f32 %v1055_v31, %v1315_v55  ;;  %v1094_v24 = vmax.f32 %v1054_v25, %v1314_v17  ;;  %v1141_v55 = vld [vmem:[%s1814_s1] sm:$0xff] }
 0x143   :  { %v1331_v56 = vpack.i.bf16 %v1095_v2, %v1094_v24 }
 0x145   :  { %1332 = vrot.lane.b32.xlu2 %v1331_v56, %s1383_s10 }
 0x15c   :  { %v1308_v7 = vpop.permute.xlu1 %1307 }
 0x15d   :  { %v1310_v57 = vunpack.i.h.bf16 %v1308_v7  ;;  %v1309_v58 = vunpack.i.l.bf16 %v1308_v7 }
 0x15f   :  { %v1060_v13 = vmax.f32 %v1020_v50, %v1310_v57  ;;  %v1059_v4 = vmax.f32 %v1019_v62, %v1309_v58  ;;  %v1203_v58 = vld [vmem:[%s1816_s3] sm:$0xff]  ;;  %s1385_s3 = smov [#allocation3]  }
 0x160   :  { %s1271_s30 = sshll.u32 %s1385_s3, 4  ;;  %s1272_s30 = int_to_ptr.vmem [resolvable:$true] %s1271_s30 }
 0x161   :  { %v1326_v61 = vpack.i.bf16 %v1060_v13, %v1059_v4 }
 0x163   :  { %1327 = vrot.lane.b32.xlu1 %v1326_v61, %s1382_s0 }
 0x173   :  { %v1318_v37 = vpop.permute.xlu2 %1317 }
 0x174   :  { %v1320_v26 = vunpack.i.h.bf16 %v1318_v37  ;;  %v1319_v18 = vunpack.i.l.bf16 %v1318_v37 }
 0x176   :  { %v1096_v63 = vmax.f32 %v1056_v33, %v1320_v26  ;;  %v1093_v1 = vmax.f32 %v1053_v34, %v1319_v18  ;;  %v1234_v18 = vld [vmem:[%s1818_s5] sm:$0xff] }
 0x178   :  { %v1336_v41 = vpack.i.bf16 %v1096_v63, %v1093_v1 }
 0x17a   :  { %1337 = vrot.lane.b32.xlu0 %v1336_v41, %s1383_s10 }
 0x182   :  { %1145 = vperm.xlu0 %1351, %v1142_v32  }
 0x19f   :  { %v1333_v20 = vpop.permute.xlu2 %1332 }
 0x1a0   :  { %v1334_v42 = vunpack.i.l.bf16 %v1333_v20  ;;  %v1335_v47 = vunpack.i.h.bf16 %v1333_v20 }
 0x1a2   :  { %v1134_v48 = vmax.f32 %v1094_v24, %v1334_v42  ;;  %v1135_v25 = vmax.f32 %v1095_v2, %v1335_v47  ;;  %v1204_v2 = vld [vmem:[%s1817_s4] sm:$0xff] }
 0x1a4   :  { %v1156_v31 = vrot.slane %v1134_v48, 7  ;;  %v1159_v49 = vrot.slane %v1135_v25, 6 }
 0x1b0   :  { %v1323_v12 = vpop.permute.xlu0 %1322 }
 0x1b1   :  { %v1325_v14 = vunpack.i.h.bf16 %v1323_v12  ;;  %v1324_v16 = vunpack.i.l.bf16 %v1323_v12 }
 0x1b3   :  { %v1098_v6 = vmax.f32 %v1058_v15, %v1325_v14  ;;  %v1097_v8 = vmax.f32 %v1057_v46, %v1324_v16 }
 0x1b5   :  { %v1341_v19 = vpack.i.bf16 %v1098_v6, %v1097_v8 }
 0x1b7   :  { %1342 = vrot.lane.b32.xlu1 %v1341_v19, %s1383_s10 }
 0x1bf   :  { %1207 = vperm.xlu1 %1352, %v1204_v2  }
 0x1d5   :  { %v1328_v21 = vpop.permute.xlu1 %1327 }
 0x1d6   :  { %v1330_v22 = vunpack.i.h.bf16 %v1328_v21  ;;  %v1329_v23 = vunpack.i.l.bf16 %v1328_v21 }
 0x1d8   :  { %v1100_v27 = vmax.f32 %v1060_v13, %v1330_v22  ;;  %v1099_v28 = vmax.f32 %v1059_v4, %v1329_v23  ;;  %v1235_v13 = vld [vmem:[%s1819_s6] sm:$0xff] }
 0x1da   :  { %v1346_v30 = vpack.i.bf16 %v1100_v27, %v1099_v28 }
 0x1dc   :  { %1347 = vrot.lane.b32.xlu2 %v1346_v30, %s1383_s10 }
 0x1e4   :  { %1238 = vperm.xlu2 %1353, %v1235_v13  }
 0x1ec   :  { %v1338_v40 = vpop.permute.xlu0 %1337 }
 0x1ed   :  { %v1339_v45 = vunpack.i.l.bf16 %v1338_v40  ;;  %v1340_v36 = vunpack.i.h.bf16 %v1338_v40 }
 0x1ef   :  { %v1133_v60 = vmax.f32 %v1093_v1, %v1339_v45  ;;  %v1136_v44 = vmax.f32 %v1096_v63, %v1340_v36 }
 0x1f1   :  { %v1158_v29 = vsel %vm1157_vm0, %v1156_v31, %v1133_v60  ;;  %v1162_v62 = vrot.slane %v1136_v44, 5 }
 0x1f2   :  { %v1161_v35 = vsel %vm1160_vm1, %v1159_v49, %v1158_v29 }
 0x1f3   :  { %v1164_v33 = vsel %vm1163_vm2, %v1162_v62, %v1161_v35 }
 0x1f4   :  { %v1146_v24 = vpop.permute.xlu0 %1145 }
 0x229   :  { %v1343_v59 = vpop.permute.xlu1 %1342 }
 0x22a   :  { %v1344_v38 = vunpack.i.l.bf16 %v1343_v59  ;;  %v1345_v11 = vunpack.i.h.bf16 %v1343_v59 }
 0x22c   :  { %v1137_v5 = vmax.f32 %v1097_v8, %v1344_v38  ;;  %v1138_v50 = vmax.f32 %v1098_v6, %v1345_v11 }
 0x22e   :  { %v1165_v9 = vrot.slane %v1137_v5, 4  ;;  %v1168_v51 = vrot.slane %v1138_v50, 3 }
 0x230   :  { %v1167_v10 = vsel %vm1166_vm3, %v1165_v9, %v1164_v33 }
 0x231   :  { %v1170_v15 = vsel %vm1169_vm4, %v1168_v51, %v1167_v10  ;;  %v1208_v4 = vpop.permute.xlu1 %1207 }
 0x236   :  { %v1348_v39 = vpop.permute.xlu2 %1347 }
 0x237   :  { %v1350_v34 = vunpack.i.h.bf16 %v1348_v39  ;;  %v1349_v52 = vunpack.i.l.bf16 %v1348_v39 }
 0x239   :  { %v1140_v3 = vmax.f32 %v1100_v27, %v1350_v34  ;;  %v1139_v43 = vmax.f32 %v1099_v28, %v1349_v52 }
 0x23b   :  { %v1171_v46 = vrot.slane %v1139_v43, 2  ;;  %v1174_v53 = vrot.slane %v1140_v3, 1 }
 0x23d   :  { %v1173_v54 = vsel %vm1172_vm5, %v1171_v46, %v1170_v15 }
 0x23e   :  { %v1176_v17 = vsel %vm1175_vm6, %v1174_v53, %v1173_v54  ;;  %v1239_v63 = vpop.permute.xlu2 %1238 }
 0x23f   :  { %1197 = vmatpush.msra.mxu0 %v1176_v17 }
 0x240   :  { %1282 = vmatmul.msk.f32.vlgmr.msra.gmra.mxu0 %vm1178_vm7, %v1141_v55 }
 0x2bd   :  { %v1199_v56 = vpop.f32.mrf.mxu0 }
 0x2be   :  { %v1200_v7 = vadd.f32 %v1199_v56, %v1146_v24 }
 0x2c0   :  { %v1202_v57 = vmax.f32 %v1200_v7, 0.0 }
 0x2c2   :  { %1228 = vmatpush.msra.mxu1 %v1202_v57 }
 0x2c3   :  { %1283 = vmatmul.msk.f32.vlgmr.msra.gmra.mxu1 %vm1178_vm7, %v1203_v58 }
 0x340   :  { %v1230_v61 = vpop.f32.mrf.mxu1 }
 0x341   :  { %v1231_v37 = vadd.f32 %v1230_v61, %v1208_v4 }
 0x343   :  { %v1233_v26 = vmax.f32 %v1231_v37, 0.0 }
 0x345   :  { %1259 = vmatpush.msra.mxu2 %v1233_v26 }
 0x346   :  { %1284 = vmatmul.msk.f32.vlgmr.msra.gmra.mxu2 %vm1178_vm7, %v1234_v18 }
 0x3c9   :  { %v1261_v1 = vpop.f32.mrf.mxu2 }
 0x3ca   :  { %v1262_v41 = vadd.f32 %v1261_v1, %v1239_v63 }
 0x3cc   :  { %1265 = vst.msk [vmem:[#allocation3] sm:$0xff] %vm1264_vm8, %v1262_v41 }
 0x3cd   :  { %1276 = dma.vmem_to_hbm [thread:$0]  %s1272_s30, 128, %s1274_s11, [#allocation4]  }
 0x3ce   :  { %1378 = dma.done.wait [#allocation4], 128  }
 0x3cf   :  { %1379 = vsyncadd [#allocation4], 4294967168 }
 0x3d0   :  { %1281 = vsyncpa [#allocation4], 1 }

</bundles_post_ra>
